<compile_context>
chip_gen: v7x
topology: tpu7x:2x2x1
jax: 0.10.0
libtpu: 0.0.40
codegen_flags: <defaults>
</compile_context>

<pallas_src>
import functools

import numpy as np
import jax
import jax.numpy as jnp
from jax.experimental import pallas as pl
from jax.experimental.pallas import tpu as pltpu


def _round_up(x, m):
    return (x + m - 1) // m * m


@functools.lru_cache(maxsize=1)
def _row_tile():
    """Generation-aware M tile for the 1x1-conv matmul kernels."""
    try:
        kind = jax.devices()[0].device_kind.lower()
    except Exception:
        return 256
    if "v5 lite" in kind or "v5e" in kind or "v5litepod" in kind:
        return 128          # 128x128 MXU, 16 MiB scoped-VMEM default
    if "v6" in kind:
        return 512          # 2x256^2 MXU, 32 MiB scoped VMEM -> big tiles pay off
    return 256              # v7x: 64 MiB physical VMEM -> stay at 256


# ----------------------------------------------------------------------------
# Kernel 1: row-tiled matmul + folded-BN scale/shift + activation epilogue.
# ----------------------------------------------------------------------------
def _matmul_bn_act_kernel(x_ref, w_ref, scale_ref, shift_ref, o_ref, *, activation):
    acc = jnp.dot(x_ref[...], w_ref[...], preferred_element_type=jnp.float32)
    y = acc * scale_ref[...] + shift_ref[...]
    if activation == "relu":
        y = jnp.maximum(y, 0.0)
    elif activation == "hswish":
        y = y * jnp.clip(y + 3.0, 0.0, 6.0) * (1.0 / 6.0)
    o_ref[...] = y.astype(o_ref.dtype)


def fused_matmul(x, w, scale, shift, activation="none", out_dtype=jnp.bfloat16):
    """x:(M,K) @ w:(K,Cout) + per-channel scale/shift + activation.
    bf16 MXU inputs, f32 accumulate/epilogue. M padded to the row tile, Cout padded
    to a lane-dense multiple of 128; padding is sliced off before returning."""
    M, K = x.shape
    Kw, Cout = w.shape
    assert K == Kw
    x = x.astype(jnp.bfloat16)
    w = w.astype(jnp.bfloat16)
    scale = scale.reshape(-1).astype(jnp.float32)
    shift = shift.reshape(-1).astype(jnp.float32)

    Cp = _round_up(Cout, 128)
    if Cp != Cout:
        w = jnp.pad(w, ((0, 0), (0, Cp - Cout)))
        scale = jnp.pad(scale, (0, Cp - Cout))
        shift = jnp.pad(shift, (0, Cp - Cout))

    # >=2 grid steps (feed both v7x TensorCores), capped at the per-gen tile.
    tm = min(_row_tile(), max(8, _round_up(-(-M // 2), 8)))
    Mp = _round_up(M, tm)
    if Mp != M:
        x = jnp.pad(x, ((0, Mp - M), (0, 0)))

    out = pl.pallas_call(
        functools.partial(_matmul_bn_act_kernel, activation=activation),
        out_shape=jax.ShapeDtypeStruct((Mp, Cp), out_dtype),
        grid_spec=pltpu.PrefetchScalarGridSpec(
            num_scalar_prefetch=0,
            grid=(Mp // tm,),
            in_specs=[
                pl.BlockSpec((tm, K), lambda i: (i, 0)),
                pl.BlockSpec((K, Cp), lambda i: (0, 0)),
                pl.BlockSpec((1, Cp), lambda i: (0, 0)),
                pl.BlockSpec((1, Cp), lambda i: (0, 0)),
            ],
            out_specs=pl.BlockSpec((tm, Cp), lambda i: (i, 0)),
        ),
        compiler_params=pltpu.CompilerParams(dimension_semantics=("parallel",)),
    )(x, w, scale.reshape(1, Cp), shift.reshape(1, Cp))
    if Mp != M or Cp != Cout:
        out = out[:M, :Cout]
    return out


# ----------------------------------------------------------------------------
# Kernel 2: grouped 3x3 conv + BN + ReLU with im2col fused in-kernel.
# ----------------------------------------------------------------------------
def _conv3x3_bn_relu_kernel(xp_ref, w_ref, scale_ref, shift_ref, o_ref, *, H, W):
    C = xp_ref.shape[-1]
    Cout = o_ref.shape[-1]
    acc = jnp.zeros((H * W, Cout), jnp.float32)
    for t in range(9):                                   # unrolled: 9 taps
        dy, dx = divmod(t, 3)
        # shifted 3x3 window tap, flattened to (H*W, C) rows (stays in VMEM/vregs)
        win = xp_ref[0, dy:dy + H, dx:dx + W, :].astype(jnp.float32)
        win = win.reshape(H * W, C).astype(jnp.bfloat16)
        acc = acc + jnp.dot(win, w_ref[t], preferred_element_type=jnp.float32)
    y = acc * scale_ref[...] + shift_ref[...]
    o_ref[0] = jnp.maximum(y, 0.0).astype(o_ref.dtype)


def conv3x3_bn_relu(xp, w_taps, scale, shift):
    """xp:(N,H+2,W+2,C) zero-padded bf16, w_taps:(9,C,Cout) bf16 -> (N,H*W,Cout) bf16.
    TODO(synk): tile H with a +/-1-row halo for very large feature maps; one image
    per grid step is fine for FPN-head sizes and keeps the kernel simple."""
    N, Hp, Wp, C = xp.shape
    H, W = Hp - 2, Wp - 2
    Cout = w_taps.shape[2]
    return pl.pallas_call(
        functools.partial(_conv3x3_bn_relu_kernel, H=H, W=W),
        out_shape=jax.ShapeDtypeStruct((N, H * W, Cout), jnp.bfloat16),
        grid_spec=pltpu.PrefetchScalarGridSpec(
            num_scalar_prefetch=0,
            grid=(N,),
            in_specs=[
                pl.BlockSpec((1, Hp, Wp, C), lambda n: (n, 0, 0, 0)),
                pl.BlockSpec((9, C, Cout), lambda n: (0, 0, 0)),
                pl.BlockSpec((1, Cout), lambda n: (0, 0)),
                pl.BlockSpec((1, Cout), lambda n: (0, 0)),
            ],
            out_specs=pl.BlockSpec((1, H * W, Cout), lambda n: (n, 0, 0)),
        ),
        compiler_params=pltpu.CompilerParams(dimension_semantics=("parallel",)),
    )(xp.astype(jnp.bfloat16), w_taps.astype(jnp.bfloat16),
      scale.reshape(1, Cout).astype(jnp.float32),
      shift.reshape(1, Cout).astype(jnp.float32))


# ----------------------------------------------------------------------------
# Kernel 3: fused block tail (1): 1x1 w3 ConvBN -> s3, global average pool,
# SE MLP (relu, sigmoid) -> per-channel gate. One kernel, no HBM round trips.
# ----------------------------------------------------------------------------
def _w3_se_kernel(s_ref, w3_ref, sc3_ref, sh3_ref, w1_ref, b1_ref, w2_ref, b2_ref,
                  s3_ref, gate_ref):
    s3 = jnp.dot(s_ref[0], w3_ref[...], preferred_element_type=jnp.float32)
    s3 = s3 * sc3_ref[...] + sh3_ref[...]                       # (HW, Cout) f32
    s3_ref[0] = s3.astype(s3_ref.dtype)
    pooled = jnp.mean(s3, axis=0, keepdims=True)                # (1, Cout)
    g = jnp.dot(pooled.astype(jnp.bfloat16), w1_ref[...],
                preferred_element_type=jnp.float32) + b1_ref[...]
    g = jnp.maximum(g, 0.0)
    g = jnp.dot(g.astype(jnp.bfloat16), w2_ref[...],
                preferred_element_type=jnp.float32) + b2_ref[...]
    gate_ref[0] = jax.nn.sigmoid(g)                             # (1, Cout) f32


def w3_bn_se(s, w3, scale3, shift3, se_w1, se_b1, se_w2, se_b2):
    N, HW, mid = s.shape
    Cout = w3.shape[1]
    cse = se_w1.shape[1]
    return pl.pallas_call(
        _w3_se_kernel,
        out_shape=(jax.ShapeDtypeStruct((N, HW, Cout), jnp.bfloat16),
                   jax.ShapeDtypeStruct((N, 1, Cout), jnp.float32)),
        grid_spec=pltpu.PrefetchScalarGridSpec(
            num_scalar_prefetch=0,
            grid=(N,),
            in_specs=[
                pl.BlockSpec((1, HW, mid), lambda n: (n, 0, 0)),
                pl.BlockSpec((mid, Cout), lambda n: (0, 0)),
                pl.BlockSpec((1, Cout), lambda n: (0, 0)),
                pl.BlockSpec((1, Cout), lambda n: (0, 0)),
                pl.BlockSpec((Cout, cse), lambda n: (0, 0)),
                pl.BlockSpec((1, cse), lambda n: (0, 0)),
                pl.BlockSpec((cse, Cout), lambda n: (0, 0)),
                pl.BlockSpec((1, Cout), lambda n: (0, 0)),
            ],
            out_specs=(pl.BlockSpec((1, HW, Cout), lambda n: (n, 0, 0)),
                       pl.BlockSpec((1, 1, Cout), lambda n: (n, 0, 0))),
        ),
        compiler_params=pltpu.CompilerParams(dimension_semantics=("parallel",)),
    )(s.astype(jnp.bfloat16), w3.astype(jnp.bfloat16),
      scale3.reshape(1, Cout).astype(jnp.float32),
      shift3.reshape(1, Cout).astype(jnp.float32),
      se_w1.astype(jnp.bfloat16), se_b1.reshape(1, cse).astype(jnp.float32),
      se_w2.astype(jnp.bfloat16), se_b2.reshape(1, Cout).astype(jnp.float32))


# ----------------------------------------------------------------------------
# Kernel 4: fused block tail (2): shortcut (projection or identity), SE gate,
# residual add, hard-swish — one pass over (HW, Cout).
# ----------------------------------------------------------------------------
def _hswish(y):
    return y * jnp.clip(y + 3.0, 0.0, 6.0) * (1.0 / 6.0)


def _tail_proj_kernel(s3_ref, gate_ref, x_ref, wsc_ref, sc_ref, sh_ref, o_ref):
    res = jnp.dot(x_ref[0], wsc_ref[...], preferred_element_type=jnp.float32)
    res = res * sc_ref[...] + sh_ref[...]
    y = res + s3_ref[0].astype(jnp.float32) * gate_ref[0]
    o_ref[0] = _hswish(y).astype(o_ref.dtype)


def _tail_id_kernel(s3_ref, gate_ref, x_ref, o_ref):
    y = x_ref[0].astype(jnp.float32) + s3_ref[0].astype(jnp.float32) * gate_ref[0]
    o_ref[0] = _hswish(y).astype(o_ref.dtype)


def block_tail(s3, gate, x, shortcut):
    N, HW, Cout = s3.shape
    Cin = x.shape[2]
    common = dict(
        out_shape=jax.ShapeDtypeStruct((N, HW, Cout), jnp.bfloat16),
        compiler_params=pltpu.CompilerParams(dimension_semantics=("parallel",)),
    )
    if shortcut is None:
        return pl.pallas_call(
            _tail_id_kernel,
            grid_spec=pltpu.PrefetchScalarGridSpec(
                num_scalar_prefetch=0, grid=(N,),
                in_specs=[
                    pl.BlockSpec((1, HW, Cout), lambda n: (n, 0, 0)),
                    pl.BlockSpec((1, 1, Cout), lambda n: (n, 0, 0)),
                    pl.BlockSpec((1, HW, Cin), lambda n: (n, 0, 0)),
                ],
                out_specs=pl.BlockSpec((1, HW, Cout), lambda n: (n, 0, 0)),
            ),
            **common,
        )(s3, gate, x.astype(jnp.bfloat16))
    w_sc, (sc, sh) = shortcut
    return pl.pallas_call(
        _tail_proj_kernel,
        grid_spec=pltpu.PrefetchScalarGridSpec(
            num_scalar_prefetch=0, grid=(N,),
            in_specs=[
                pl.BlockSpec((1, HW, Cout), lambda n: (n, 0, 0)),
                pl.BlockSpec((1, 1, Cout), lambda n: (n, 0, 0)),
                pl.BlockSpec((1, HW, Cin), lambda n: (n, 0, 0)),
                pl.BlockSpec((Cin, Cout), lambda n: (0, 0)),
                pl.BlockSpec((1, Cout), lambda n: (0, 0)),
                pl.BlockSpec((1, Cout), lambda n: (0, 0)),
            ],
            out_specs=pl.BlockSpec((1, HW, Cout), lambda n: (n, 0, 0)),
        ),
        **common,
    )(s3, gate, x.astype(jnp.bfloat16), w_sc.astype(jnp.bfloat16),
      sc.reshape(1, Cout).astype(jnp.float32), sh.reshape(1, Cout).astype(jnp.float32))


# ----------------------------------------------------------------------------
# Parameter construction (deterministic), BN folded, weights in bf16.
# ----------------------------------------------------------------------------
def grouped_conv_to_tapwise_dense(w, groups):
    """Torch grouped conv weight (Cout, Cin//g, 3, 3) -> per-tap dense (9, Cin, Cout)
    keeping the block-diagonal group structure (exact grouped-conv semantics)."""
    w = np.asarray(w, dtype=np.float32)
    Cout, Cg, KH, KW = w.shape
    Cin = Cg * groups
    cpg_out = Cout // groups
    dense = np.zeros((KH * KW, Cin, Cout), np.float32)
    for co in range(Cout):
        g = co // cpg_out
        for cg in range(Cg):
            ci = g * Cg + cg
            for ky in range(KH):
                for kx in range(KW):
                    dense[ky * KW + kx, ci, co] = w[co, cg, ky, kx]
    return jnp.asarray(dense, jnp.bfloat16)


def bn_fold(key, c, eps=1e-5):
    k1, k2, k3, k4 = jax.random.split(key, 4)
    gamma = 1.0 + 0.1 * jax.random.normal(k1, (c,), jnp.float32)
    beta = 0.1 * jax.random.normal(k2, (c,), jnp.float32)
    mean = 0.1 * jax.random.normal(k3, (c,), jnp.float32)
    var = 1.0 + 0.1 * jax.random.uniform(k4, (c,), jnp.float32)
    scale = gamma / jnp.sqrt(var + eps)
    shift = beta - mean * scale
    return scale, shift


def init_senext_block(key, cin, cout, groups=16, reduction=8):
    mid = groups * (cout // 2 // groups)
    keys = jax.random.split(key, 12)
    p = {"mid": mid}
    p["w1"] = (jax.random.normal(keys[0], (cin, mid), jnp.float32)
               / np.sqrt(cin)).astype(jnp.bfloat16)
    p["bn1"] = bn_fold(keys[1], mid)
    wg = jax.random.normal(keys[2], (mid, mid // groups, 3, 3), jnp.float32) \
        / np.sqrt(9 * mid // groups)
    p["w2"] = grouped_conv_to_tapwise_dense(np.asarray(wg), groups)   # (9, mid, mid)
    p["bn2"] = bn_fold(keys[3], mid)
    p["w3"] = (jax.random.normal(keys[4], (mid, cout), jnp.float32)
               / np.sqrt(mid)).astype(jnp.bfloat16)
    p["bn3"] = bn_fold(keys[5], cout)
    cse = max(cout // reduction, 1)
    p["se_w1"] = (jax.random.normal(keys[6], (cout, cse), jnp.float32)
                  / np.sqrt(cout)).astype(jnp.bfloat16)
    p["se_b1"] = 0.1 * jax.random.normal(keys[7], (cse,), jnp.float32)
    p["se_w2"] = (jax.random.normal(keys[8], (cse, cout), jnp.float32)
                  / np.sqrt(cse)).astype(jnp.bfloat16)
    p["se_b2"] = 0.1 * jax.random.normal(keys[9], (cout,), jnp.float32)
    p["shortcut"] = None
    if cin != cout:  # projection shortcut so the residual add is well defined
        p["shortcut"] = (
            (jax.random.normal(keys[10], (cin, cout), jnp.float32)
             / np.sqrt(cin)).astype(jnp.bfloat16),
            bn_fold(keys[11], cout),
        )
    return p


def init_regression_model(key, in_channels, out_size=4, num_anchors=9,
                          hidden_channels=256, depth=1):
    keys = jax.random.split(key, depth + 3)
    params = {
        "out_size": out_size,
        "in_conv": init_senext_block(keys[0], in_channels, hidden_channels),
        "bottlenecks": [init_senext_block(keys[1 + i], hidden_channels, hidden_channels)
                        for i in range(depth)],
    }
    out_c = num_anchors * out_size
    params["out_w"] = (jax.random.normal(keys[depth + 1], (hidden_channels, out_c),
                                         jnp.float32) / np.sqrt(hidden_channels)
                       ).astype(jnp.bfloat16)
    params["out_b"] = 0.1 * jax.random.normal(keys[depth + 2], (out_c,), jnp.float32)
    return params


# ----------------------------------------------------------------------------
# Forward pass
# ----------------------------------------------------------------------------
def senext_block_forward(p, x_nhwc):
    N, H, W, Cin = x_nhwc.shape
    mid = p["mid"]
    cout = p["w3"].shape[1]
    M = N * H * W
    x2 = x_nhwc.reshape(M, Cin)

    # 1x1 ConvBN + ReLU
    s = fused_matmul(x2, p["w1"], *p["bn1"], activation="relu")            # (M, mid)
    # grouped 3x3 ConvBN + ReLU (im2col fused in-kernel; only the zero halo hits HBM)
    sp = jnp.pad(s.reshape(N, H, W, mid), ((0, 0), (1, 1), (1, 1), (0, 0)))
    s = conv3x3_bn_relu(sp, p["w2"], *p["bn2"])                            # (N, HW, mid)
    # 1x1 ConvBN + GAP + SE MLP + sigmoid (single fused kernel)
    s3, gate = w3_bn_se(s, p["w3"], *p["bn3"], p["se_w1"], p["se_b1"],
                        p["se_w2"], p["se_b2"])
    # shortcut + SE gate + residual + hard-swish (single fused kernel)
    out = block_tail(s3, gate, x_nhwc.reshape(N, H * W, Cin), p["shortcut"])
    return out.reshape(N, H, W, cout)


def regression_model_forward(params, x_nchw):
    """x_nchw: (N, C, H, W) like PyTorch. Returns (N, H*W*num_anchors, out_size)."""
    x = jnp.transpose(x_nchw, (0, 2, 3, 1)).astype(jnp.bfloat16)   # NCHW -> NHWC
    x = senext_block_forward(params["in_conv"], x)
    for bp in params["bottlenecks"]:
        x = senext_block_forward(bp, x)
    N, H, W, C = x.shape
    out_c = params["out_w"].shape[1]
    out_size = params["out_size"]
    # final 1x1 conv with bias (no BN, no activation); lane-dense padded in-kernel
    y = fused_matmul(x.reshape(N * H * W, C), params["out_w"],
                     jnp.ones((out_c,), jnp.float32), params["out_b"],
                     activation="none", out_dtype=jnp.float32)
    # Torch: permute(0,2,3,1).view(N, -1, out_size) == NHWC row-major reshape
    return y.reshape(N, H, W, out_c).reshape(N, H * W * (out_c // out_size), out_size)


# ----------------------------------------------------------------------------
if __name__ == "__main__":
    key = jax.random.PRNGKey(0)
    k_in, k_param = jax.random.split(key)

    N, Cin, H, W = 2, 16, 8, 8
    hidden, anchors, out_size, depth = 64, 9, 4, 1

    x = jax.random.normal(k_in, (N, Cin, H, W), jnp.float32)
    params = init_regression_model(k_param, Cin, out_size=out_size,
                                   num_anchors=anchors,
                                   hidden_channels=hidden, depth=depth)

    fwd = jax.jit(lambda inp: regression_model_forward(params, inp))
    y = jax.block_until_ready(fwd(x))
    assert y.shape == (N, H * W * anchors, out_size), y.shape
    assert bool(jnp.all(jnp.isfinite(y)))
    print("KERNEL_OK")
</pallas_src>

<mosaic_0001>
module attributes {stable_mosaic.version = 11 : i64} {
  func.func @_w3_se_kernel(%arg0: i32, %arg1: memref<1x64x32xbf16, #tpu.memory_space<vmem>>, %arg2: memref<32x64xbf16, #tpu.memory_space<vmem>>, %arg3: memref<1x64xf32, #tpu.memory_space<vmem>>, %arg4: memref<1x64xf32, #tpu.memory_space<vmem>>, %arg5: memref<64x8xbf16, #tpu.memory_space<vmem>>, %arg6: memref<1x8xf32, #tpu.memory_space<vmem>>, %arg7: memref<8x64xbf16, #tpu.memory_space<vmem>>, %arg8: memref<1x64xf32, #tpu.memory_space<vmem>>, %arg9: memref<1x64x64xbf16, #tpu.memory_space<vmem>>, %arg10: memref<1x1x64xf32, #tpu.memory_space<vmem>>) attributes {dimension_semantics = [#tpu.dimension_semantics<parallel>], iteration_bounds = array<i64: 2>, scalar_prefetch = 0 : i64, scratch_operands = 0 : i64, tpu.core_type = #tpu.core_type<tc>, window_params = [{transform_indices = @transform_0, window_bounds = array<i64: 1, 64, 32>}, {pipeline_mode = #tpu.pipeline_mode<synchronous>, transform_indices = @transform_1, window_bounds = array<i64: 32, 64>}, {pipeline_mode = #tpu.pipeline_mode<synchronous>, transform_indices = @transform_2, window_bounds = array<i64: 1, 64>}, {pipeline_mode = #tpu.pipeline_mode<synchronous>, transform_indices = @transform_3, window_bounds = array<i64: 1, 64>}, {pipeline_mode = #tpu.pipeline_mode<synchronous>, transform_indices = @transform_4, window_bounds = array<i64: 64, 8>}, {pipeline_mode = #tpu.pipeline_mode<synchronous>, transform_indices = @transform_5, window_bounds = array<i64: 1, 8>}, {pipeline_mode = #tpu.pipeline_mode<synchronous>, transform_indices = @transform_6, window_bounds = array<i64: 8, 64>}, {pipeline_mode = #tpu.pipeline_mode<synchronous>, transform_indices = @transform_7, window_bounds = array<i64: 1, 64>}, {transform_indices = @transform_8, window_bounds = array<i64: 1, 64, 64>}, {transform_indices = @transform_9, window_bounds = array<i64: 1, 1, 64>}]} {
    %c0 = arith.constant 0 : index
    %c0_0 = arith.constant 0 : index
    %c0_1 = arith.constant 0 : index
    %0 = vector.load %arg1[%c0, %c0_0, %c0_1] : memref<1x64x32xbf16, #tpu.memory_space<vmem>>, vector<1x64x32xbf16>
    %1 = vector.shape_cast %0 : vector<1x64x32xbf16> to vector<64x32xbf16>
    %c0_2 = arith.constant 0 : index
    %c0_3 = arith.constant 0 : index
    %2 = vector.load %arg2[%c0_2, %c0_3] : memref<32x64xbf16, #tpu.memory_space<vmem>>, vector<32x64xbf16>
    %cst = arith.constant dense<0.000000e+00> : vector<64x64xf32>
    %3 = tpu.matmul %1, %2, %cst {dimension_numbers = #tpu.dot_dimension_numbers<[1], [0], [0], [1], [0, 0, 1, 1], [], []>} : vector<64x32xbf16>, vector<32x64xbf16>, vector<64x64xf32> -> vector<64x64xf32>
    %c0_4 = arith.constant 0 : index
    %c0_5 = arith.constant 0 : index
    %4 = vector.load %arg3[%c0_4, %c0_5] : memref<1x64xf32, #tpu.memory_space<vmem>>, vector<1x64xf32>
    %5 = vector.broadcast %4 : vector<1x64xf32> to vector<64x64xf32>
    %6 = arith.mulf %3, %5 : vector<64x64xf32>
    %c0_6 = arith.constant 0 : index
    %c0_7 = arith.constant 0 : index
    %7 = vector.load %arg4[%c0_6, %c0_7] : memref<1x64xf32, #tpu.memory_space<vmem>>, vector<1x64xf32>
    %8 = vector.broadcast %7 : vector<1x64xf32> to vector<64x64xf32>
    %9 = arith.addf %6, %8 : vector<64x64xf32>
    %10 = arith.truncf %9 : vector<64x64xf32> to vector<64x64xbf16>
    %c0_8 = arith.constant 0 : index
    %c0_9 = arith.constant 0 : index
    %c0_10 = arith.constant 0 : index
    %11 = vector.load %arg9[%c0_8, %c0_9, %c0_10] : memref<1x64x64xbf16, #tpu.memory_space<vmem>>, vector<1x64x64xbf16>
    %12 = vector.shape_cast %11 : vector<1x64x64xbf16> to vector<64x64xbf16>
    %13 = vector.shape_cast %10 : vector<64x64xbf16> to vector<1x64x64xbf16>
    tpu.vector_store %arg9[%c0_8, %c0_9, %c0_10], %13 {strides = array<i32>} : memref<1x64x64xbf16, #tpu.memory_space<vmem>>, vector<1x64x64xbf16>,
    %cst_11 = arith.constant dense<0.000000e+00> : vector<64xf32>
    %14 = vector.multi_reduction <add>, %9, %cst_11 [0] : vector<64x64xf32> to vector<64xf32>
    %15 = vector.shape_cast %14 : vector<64xf32> to vector<1x64xf32>
    %cst_12 = arith.constant 6.400000e+01 : f32
    %16 = vector.broadcast %cst_12 : f32 to vector<1x64xf32>
    %17 = arith.divf %15, %16 : vector<1x64xf32>
    %18 = arith.truncf %17 : vector<1x64xf32> to vector<1x64xbf16>
    %c0_13 = arith.constant 0 : index
    %c0_14 = arith.constant 0 : index
    %19 = vector.load %arg5[%c0_13, %c0_14] : memref<64x8xbf16, #tpu.memory_space<vmem>>, vector<64x8xbf16>
    %cst_15 = arith.constant dense<0.000000e+00> : vector<1x8xf32>
    %20 = tpu.matmul %18, %19, %cst_15 {dimension_numbers = #tpu.dot_dimension_numbers<[1], [0], [0], [1], [0, 0, 1, 1], [], []>} : vector<1x64xbf16>, vector<64x8xbf16>, vector<1x8xf32> -> vector<1x8xf32>
    %c0_16 = arith.constant 0 : index
    %c0_17 = arith.constant 0 : index
    %21 = vector.load %arg6[%c0_16, %c0_17] : memref<1x8xf32, #tpu.memory_space<vmem>>, vector<1x8xf32>
    %22 = arith.addf %20, %21 : vector<1x8xf32>
    %cst_18 = arith.constant 0.000000e+00 : f32
    %23 = vector.broadcast %cst_18 : f32 to vector<1x8xf32>
    %24 = arith.maximumf %22, %23 : vector<1x8xf32>
    %25 = arith.truncf %24 : vector<1x8xf32> to vector<1x8xbf16>
    %c0_19 = arith.constant 0 : index
    %c0_20 = arith.constant 0 : index
    %26 = vector.load %arg7[%c0_19, %c0_20] : memref<8x64xbf16, #tpu.memory_space<vmem>>, vector<8x64xbf16>
    %cst_21 = arith.constant dense<0.000000e+00> : vector<1x64xf32>
    %27 = tpu.matmul %25, %26, %cst_21 {dimension_numbers = #tpu.dot_dimension_numbers<[1], [0], [0], [1], [0, 0, 1, 1], [], []>} : vector<1x8xbf16>, vector<8x64xbf16>, vector<1x64xf32> -> vector<1x64xf32>
    %c0_22 = arith.constant 0 : index
    %c0_23 = arith.constant 0 : index
    %28 = vector.load %arg8[%c0_22, %c0_23] : memref<1x64xf32, #tpu.memory_space<vmem>>, vector<1x64xf32>
    %29 = arith.addf %27, %28 : vector<1x64xf32>
    %30 = arith.negf %29 : vector<1x64xf32>
    %31 = math.exp %30 : vector<1x64xf32>
    %cst_24 = arith.constant 1.000000e+00 : f32
    %32 = vector.broadcast %cst_24 : f32 to vector<1x64xf32>
    %33 = arith.addf %32, %31 : vector<1x64xf32>
    %34 = arith.divf %32, %33 : vector<1x64xf32>
    %c0_25 = arith.constant 0 : index
    %c0_26 = arith.constant 0 : index
    %c0_27 = arith.constant 0 : index
    %35 = vector.load %arg10[%c0_25, %c0_26, %c0_27] : memref<1x1x64xf32, #tpu.memory_space<vmem>>, vector<1x1x64xf32>
    %36 = vector.shape_cast %35 : vector<1x1x64xf32> to vector<1x64xf32>
    %37 = vector.shape_cast %34 : vector<1x64xf32> to vector<1x1x64xf32>
    tpu.vector_store %arg10[%c0_25, %c0_26, %c0_27], %37 {strides = array<i32>} : memref<1x1x64xf32, #tpu.memory_space<vmem>>, vector<1x1x64xf32>,
    return
  }
  func.func @transform_0(%arg0: i32) -> (i32, i32, i32) {
    %c0_i32 = arith.constant 0 : i32
    %c0_i32_0 = arith.constant 0 : i32
    %c0_i32_1 = arith.constant 0 : i32
    return %arg0, %c0_i32, %c0_i32_0 : i32, i32, i32
  }
  func.func @transform_1(%arg0: i32) -> (i32, i32) {
    %c0_i32 = arith.constant 0 : i32
    %c0_i32_0 = arith.constant 0 : i32
    %c0_i32_1 = arith.constant 0 : i32
    return %c0_i32, %c0_i32_0 : i32, i32
  }
  func.func @transform_2(%arg0: i32) -> (i32, i32) {
    %c0_i32 = arith.constant 0 : i32
    %c0_i32_0 = arith.constant 0 : i32
    %c0_i32_1 = arith.constant 0 : i32
    return %c0_i32, %c0_i32_0 : i32, i32
  }
  func.func @transform_3(%arg0: i32) -> (i32, i32) {
    %c0_i32 = arith.constant 0 : i32
    %c0_i32_0 = arith.constant 0 : i32
    %c0_i32_1 = arith.constant 0 : i32
    return %c0_i32, %c0_i32_0 : i32, i32
  }
  func.func @transform_4(%arg0: i32) -> (i32, i32) {
    %c0_i32 = arith.constant 0 : i32
    %c0_i32_0 = arith.constant 0 : i32
    %c0_i32_1 = arith.constant 0 : i32
    return %c0_i32, %c0_i32_0 : i32, i32
  }
  func.func @transform_5(%arg0: i32) -> (i32, i32) {
    %c0_i32 = arith.constant 0 : i32
    %c0_i32_0 = arith.constant 0 : i32
    %c0_i32_1 = arith.constant 0 : i32
    return %c0_i32, %c0_i32_0 : i32, i32
  }
  func.func @transform_6(%arg0: i32) -> (i32, i32) {
    %c0_i32 = arith.constant 0 : i32
    %c0_i32_0 = arith.constant 0 : i32
    %c0_i32_1 = arith.constant 0 : i32
    return %c0_i32, %c0_i32_0 : i32, i32
  }
  func.func @transform_7(%arg0: i32) -> (i32, i32) {
    %c0_i32 = arith.constant 0 : i32
    %c0_i32_0 = arith.constant 0 : i32
    %c0_i32_1 = arith.constant 0 : i32
    return %c0_i32, %c0_i32_0 : i32, i32
  }
  func.func @transform_8(%arg0: i32) -> (i32, i32, i32) {
    %c0_i32 = arith.constant 0 : i32
    %c0_i32_0 = arith.constant 0 : i32
    %c0_i32_1 = arith.constant 0 : i32
    return %arg0, %c0_i32, %c0_i32_0 : i32, i32, i32
  }
  func.func @transform_9(%arg0: i32) -> (i32, i32, i32) {
    %c0_i32 = arith.constant 0 : i32
    %c0_i32_0 = arith.constant 0 : i32
    %c0_i32_1 = arith.constant 0 : i32
    return %arg0, %c0_i32, %c0_i32_0 : i32, i32, i32
  }
}

module attributes {stable_mosaic.version = 11 : i64} {
  func.func @_matmul_bn_act_kernel(%arg0: i32, %arg1: memref<64x16xbf16, #tpu.memory_space<vmem>>, %arg2: memref<16x128xbf16, #tpu.memory_space<vmem>>, %arg3: memref<1x128xf32, #tpu.memory_space<vmem>>, %arg4: memref<1x128xf32, #tpu.memory_space<vmem>>, %arg5: memref<64x128xbf16, #tpu.memory_space<vmem>>) attributes {dimension_semantics = [#tpu.dimension_semantics<parallel>], iteration_bounds = array<i64: 2>, scalar_prefetch = 0 : i64, scratch_operands = 0 : i64, tpu.core_type = #tpu.core_type<tc>, window_params = [{transform_indices = @transform_0, window_bounds = array<i64: 64, 16>}, {pipeline_mode = #tpu.pipeline_mode<synchronous>, transform_indices = @transform_1, window_bounds = array<i64: 16, 128>}, {pipeline_mode = #tpu.pipeline_mode<synchronous>, transform_indices = @transform_2, window_bounds = array<i64: 1, 128>}, {pipeline_mode = #tpu.pipeline_mode<synchronous>, transform_indices = @transform_3, window_bounds = array<i64: 1, 128>}, {transform_indices = @transform_4, window_bounds = array<i64: 64, 128>}]} {
    %c0 = arith.constant 0 : index
    %c0_0 = arith.constant 0 : index
    %0 = vector.load %arg1[%c0, %c0_0] : memref<64x16xbf16, #tpu.memory_space<vmem>>, vector<64x16xbf16>
    %c0_1 = arith.constant 0 : index
    %c0_2 = arith.constant 0 : index
    %1 = vector.load %arg2[%c0_1, %c0_2] : memref<16x128xbf16, #tpu.memory_space<vmem>>, vector<16x128xbf16>
    %cst = arith.constant dense<0.000000e+00> : vector<64x128xf32>
    %2 = tpu.matmul %0, %1, %cst {dimension_numbers = #tpu.dot_dimension_numbers<[1], [0], [0], [1], [0, 0, 1, 1], [], []>} : vector<64x16xbf16>, vector<16x128xbf16>, vector<64x128xf32> -> vector<64x128xf32>
    %c0_3 = arith.constant 0 : index
    %c0_4 = arith.constant 0 : index
    %3 = vector.load %arg3[%c0_3, %c0_4] : memref<1x128xf32, #tpu.memory_space<vmem>>, vector<1x128xf32>
    %4 = vector.broadcast %3 : vector<1x128xf32> to vector<64x128xf32>
    %5 = arith.mulf %2, %4 : vector<64x128xf32>
    %c0_5 = arith.constant 0 : index
    %c0_6 = arith.constant 0 : index
    %6 = vector.load %arg4[%c0_5, %c0_6] : memref<1x128xf32, #tpu.memory_space<vmem>>, vector<1x128xf32>
    %7 = vector.broadcast %6 : vector<1x128xf32> to vector<64x128xf32>
    %8 = arith.addf %5, %7 : vector<64x128xf32>
    %cst_7 = arith.constant 0.000000e+00 : f32
    %9 = vector.broadcast %cst_7 : f32 to vector<64x128xf32>
    %10 = arith.maximumf %8, %9 : vector<64x128xf32>
    %11 = arith.truncf %10 : vector<64x128xf32> to vector<64x128xbf16>
    %c0_8 = arith.constant 0 : index
    %c0_9 = arith.constant 0 : index
    %12 = vector.load %arg5[%c0_8, %c0_9] : memref<64x128xbf16, #tpu.memory_space<vmem>>, vector<64x128xbf16>
    tpu.vector_store %arg5[%c0_8, %c0_9], %11 {strides = array<i32>} : memref<64x128xbf16, #tpu.memory_space<vmem>>, vector<64x128xbf16>,
    return
  }
  func.func @transform_0(%arg0: i32) -> (i32, i32) {
    %c0_i32 = arith.constant 0 : i32
    %c0_i32_0 = arith.constant 0 : i32
    return %arg0, %c0_i32 : i32, i32
  }
  func.func @transform_1(%arg0: i32) -> (i32, i32) {
    %c0_i32 = arith.constant 0 : i32
    %c0_i32_0 = arith.constant 0 : i32
    %c0_i32_1 = arith.constant 0 : i32
    return %c0_i32, %c0_i32_0 : i32, i32
  }
  func.func @transform_2(%arg0: i32) -> (i32, i32) {
    %c0_i32 = arith.constant 0 : i32
    %c0_i32_0 = arith.constant 0 : i32
    %c0_i32_1 = arith.constant 0 : i32
    return %c0_i32, %c0_i32_0 : i32, i32
  }
  func.func @transform_3(%arg0: i32) -> (i32, i32) {
    %c0_i32 = arith.constant 0 : i32
    %c0_i32_0 = arith.constant 0 : i32
    %c0_i32_1 = arith.constant 0 : i32
    return %c0_i32, %c0_i32_0 : i32, i32
  }
  func.func @transform_4(%arg0: i32) -> (i32, i32) {
    %c0_i32 = arith.constant 0 : i32
    %c0_i32_0 = arith.constant 0 : i32
    return %arg0, %c0_i32 : i32, i32
  }
}

module attributes {stable_mosaic.version = 11 : i64} {
  func.func @_tail_proj_kernel(%arg0: i32, %arg1: memref<1x64x64xbf16, #tpu.memory_space<vmem>>, %arg2: memref<1x1x64xf32, #tpu.memory_space<vmem>>, %arg3: memref<1x64x16xbf16, #tpu.memory_space<vmem>>, %arg4: memref<16x64xbf16, #tpu.memory_space<vmem>>, %arg5: memref<1x64xf32, #tpu.memory_space<vmem>>, %arg6: memref<1x64xf32, #tpu.memory_space<vmem>>, %arg7: memref<1x64x64xbf16, #tpu.memory_space<vmem>>) attributes {dimension_semantics = [#tpu.dimension_semantics<parallel>], iteration_bounds = array<i64: 2>, scalar_prefetch = 0 : i64, scratch_operands = 0 : i64, tpu.core_type = #tpu.core_type<tc>, window_params = [{transform_indices = @transform_0, window_bounds = array<i64: 1, 64, 64>}, {transform_indices = @transform_1, window_bounds = array<i64: 1, 1, 64>}, {transform_indices = @transform_2, window_bounds = array<i64: 1, 64, 16>}, {pipeline_mode = #tpu.pipeline_mode<synchronous>, transform_indices = @transform_3, window_bounds = array<i64: 16, 64>}, {pipeline_mode = #tpu.pipeline_mode<synchronous>, transform_indices = @transform_4, window_bounds = array<i64: 1, 64>}, {pipeline_mode = #tpu.pipeline_mode<synchronous>, transform_indices = @transform_5, window_bounds = array<i64: 1, 64>}, {transform_indices = @transform_6, window_bounds = array<i64: 1, 64, 64>}]} {
    %c0 = arith.constant 0 : index
    %c0_0 = arith.constant 0 : index
    %c0_1 = arith.constant 0 : index
    %0 = vector.load %arg3[%c0, %c0_0, %c0_1] : memref<1x64x16xbf16, #tpu.memory_space<vmem>>, vector<1x64x16xbf16>
    %1 = vector.shape_cast %0 : vector<1x64x16xbf16> to vector<64x16xbf16>
    %c0_2 = arith.constant 0 : index
    %c0_3 = arith.constant 0 : index
    %2 = vector.load %arg4[%c0_2, %c0_3] : memref<16x64xbf16, #tpu.memory_space<vmem>>, vector<16x64xbf16>
    %cst = arith.constant dense<0.000000e+00> : vector<64x64xf32>
    %3 = tpu.matmul %1, %2, %cst {dimension_numbers = #tpu.dot_dimension_numbers<[1], [0], [0], [1], [0, 0, 1, 1], [], []>} : vector<64x16xbf16>, vector<16x64xbf16>, vector<64x64xf32> -> vector<64x64xf32>
    %c0_4 = arith.constant 0 : index
    %c0_5 = arith.constant 0 : index
    %4 = vector.load %arg5[%c0_4, %c0_5] : memref<1x64xf32, #tpu.memory_space<vmem>>, vector<1x64xf32>
    %5 = vector.broadcast %4 : vector<1x64xf32> to vector<64x64xf32>
    %6 = arith.mulf %3, %5 : vector<64x64xf32>
    %c0_6 = arith.constant 0 : index
    %c0_7 = arith.constant 0 : index
    %7 = vector.load %arg6[%c0_6, %c0_7] : memref<1x64xf32, #tpu.memory_space<vmem>>, vector<1x64xf32>
    %8 = vector.broadcast %7 : vector<1x64xf32> to vector<64x64xf32>
    %9 = arith.addf %6, %8 : vector<64x64xf32>
    %c0_8 = arith.constant 0 : index
    %c0_9 = arith.constant 0 : index
    %c0_10 = arith.constant 0 : index
    %10 = vector.load %arg1[%c0_8, %c0_9, %c0_10] : memref<1x64x64xbf16, #tpu.memory_space<vmem>>, vector<1x64x64xbf16>
    %11 = vector.shape_cast %10 : vector<1x64x64xbf16> to vector<64x64xbf16>
    %12 = arith.extf %11 : vector<64x64xbf16> to vector<64x64xf32>
    %c0_11 = arith.constant 0 : index
    %c0_12 = arith.constant 0 : index
    %c0_13 = arith.constant 0 : index
    %13 = vector.load %arg2[%c0_11, %c0_12, %c0_13] : memref<1x1x64xf32, #tpu.memory_space<vmem>>, vector<1x1x64xf32>
    %14 = vector.shape_cast %13 : vector<1x1x64xf32> to vector<1x64xf32>
    %15 = vector.broadcast %14 : vector<1x64xf32> to vector<64x64xf32>
    %16 = arith.mulf %12, %15 : vector<64x64xf32>
    %17 = arith.addf %9, %16 : vector<64x64xf32>
    %cst_14 = arith.constant 3.000000e+00 : f32
    %18 = vector.broadcast %cst_14 : f32 to vector<64x64xf32>
    %19 = arith.addf %17, %18 : vector<64x64xf32>
    %cst_15 = arith.constant 0.000000e+00 : f32
    %cst_16 = arith.constant 6.000000e+00 : f32
    %20 = vector.broadcast %cst_15 : f32 to vector<64x64xf32>
    %21 = arith.maximumf %20, %19 : vector<64x64xf32>
    %22 = vector.broadcast %cst_16 : f32 to vector<64x64xf32>
    %23 = arith.minimumf %22, %21 : vector<64x64xf32>
    %24 = arith.mulf %17, %23 : vector<64x64xf32>
    %cst_17 = arith.constant 0.166666672 : f32
    %25 = vector.broadcast %cst_17 : f32 to vector<64x64xf32>
    %26 = arith.mulf %24, %25 : vector<64x64xf32>
    %27 = arith.truncf %26 : vector<64x64xf32> to vector<64x64xbf16>
    %c0_18 = arith.constant 0 : index
    %c0_19 = arith.constant 0 : index
    %c0_20 = arith.constant 0 : index
    %28 = vector.load %arg7[%c0_18, %c0_19, %c0_20] : memref<1x64x64xbf16, #tpu.memory_space<vmem>>, vector<1x64x64xbf16>
    %29 = vector.shape_cast %28 : vector<1x64x64xbf16> to vector<64x64xbf16>
    %30 = vector.shape_cast %27 : vector<64x64xbf16> to vector<1x64x64xbf16>
    tpu.vector_store %arg7[%c0_18, %c0_19, %c0_20], %30 {strides = array<i32>} : memref<1x64x64xbf16, #tpu.memory_space<vmem>>, vector<1x64x64xbf16>,
    return
  }
  func.func @transform_0(%arg0: i32) -> (i32, i32, i32) {
    %c0_i32 = arith.constant 0 : i32
    %c0_i32_0 = arith.constant 0 : i32
    %c0_i32_1 = arith.constant 0 : i32
    return %arg0, %c0_i32, %c0_i32_0 : i32, i32, i32
  }
  func.func @transform_1(%arg0: i32) -> (i32, i32, i32) {
    %c0_i32 = arith.constant 0 : i32
    %c0_i32_0 = arith.constant 0 : i32
    %c0_i32_1 = arith.constant 0 : i32
    return %arg0, %c0_i32, %c0_i32_0 : i32, i32, i32
  }
  func.func @transform_2(%arg0: i32) -> (i32, i32, i32) {
    %c0_i32 = arith.constant 0 : i32
    %c0_i32_0 = arith.constant 0 : i32
    %c0_i32_1 = arith.constant 0 : i32
    return %arg0, %c0_i32, %c0_i32_0 : i32, i32, i32
  }
  func.func @transform_3(%arg0: i32) -> (i32, i32) {
    %c0_i32 = arith.constant 0 : i32
    %c0_i32_0 = arith.constant 0 : i32
    %c0_i32_1 = arith.constant 0 : i32
    return %c0_i32, %c0_i32_0 : i32, i32
  }
  func.func @transform_4(%arg0: i32) -> (i32, i32) {
    %c0_i32 = arith.constant 0 : i32
    %c0_i32_0 = arith.constant 0 : i32
    %c0_i32_1 = arith.constant 0 : i32
    return %c0_i32, %c0_i32_0 : i32, i32
  }
  func.func @transform_5(%arg0: i32) -> (i32, i32) {
    %c0_i32 = arith.constant 0 : i32
    %c0_i32_0 = arith.constant 0 : i32
    %c0_i32_1 = arith.constant 0 : i32
    return %c0_i32, %c0_i32_0 : i32, i32
  }
  func.func @transform_6(%arg0: i32) -> (i32, i32, i32) {
    %c0_i32 = arith.constant 0 : i32
    %c0_i32_0 = arith.constant 0 : i32
    %c0_i32_1 = arith.constant 0 : i32
    return %arg0, %c0_i32, %c0_i32_0 : i32, i32, i32
  }
}

module attributes {stable_mosaic.version = 11 : i64} {
  func.func @_conv3x3_bn_relu_kernel(%arg0: i32, %arg1: memref<1x10x10x32xbf16, #tpu.memory_space<vmem>>, %arg2: memref<9x32x32xbf16, #tpu.memory_space<vmem>>, %arg3: memref<1x32xf32, #tpu.memory_space<vmem>>, %arg4: memref<1x32xf32, #tpu.memory_space<vmem>>, %arg5: memref<1x64x32xbf16, #tpu.memory_space<vmem>>) attributes {dimension_semantics = [#tpu.dimension_semantics<parallel>], iteration_bounds = array<i64: 2>, scalar_prefetch = 0 : i64, scratch_operands = 0 : i64, tpu.core_type = #tpu.core_type<tc>, window_params = [{transform_indices = @transform_0, window_bounds = array<i64: 1, 10, 10, 32>}, {pipeline_mode = #tpu.pipeline_mode<synchronous>, transform_indices = @transform_1, window_bounds = array<i64: 9, 32, 32>}, {pipeline_mode = #tpu.pipeline_mode<synchronous>, transform_indices = @transform_2, window_bounds = array<i64: 1, 32>}, {pipeline_mode = #tpu.pipeline_mode<synchronous>, transform_indices = @transform_3, window_bounds = array<i64: 1, 32>}, {transform_indices = @transform_4, window_bounds = array<i64: 1, 64, 32>}]} {
    %cst = arith.constant 0.000000e+00 : f32
    %0 = vector.broadcast %cst : f32 to vector<64x32xf32>
    %c0 = arith.constant 0 : index
    %c0_0 = arith.constant 0 : index
    %c0_1 = arith.constant 0 : index
    %c0_2 = arith.constant 0 : index
    %1 = vector.load %arg1[%c0, %c0_0, %c0_1, %c0_2] : memref<1x10x10x32xbf16, #tpu.memory_space<vmem>>, vector<1x8x8x32xbf16>
    %2 = vector.shape_cast %1 : vector<1x8x8x32xbf16> to vector<8x8x32xbf16>
    %3 = arith.extf %2 : vector<8x8x32xbf16> to vector<8x8x32xf32>
    %4 = vector.shape_cast %3 : vector<8x8x32xf32> to vector<64x32xf32>
    %5 = arith.truncf %4 : vector<64x32xf32> to vector<64x32xbf16>
    %c0_3 = arith.constant 0 : index
    %c0_4 = arith.constant 0 : index
    %c0_5 = arith.constant 0 : index
    %6 = vector.load %arg2[%c0_3, %c0_4, %c0_5] : memref<9x32x32xbf16, #tpu.memory_space<vmem>>, vector<1x32x32xbf16>
    %7 = vector.shape_cast %6 : vector<1x32x32xbf16> to vector<32x32xbf16>
    %cst_6 = arith.constant dense<0.000000e+00> : vector<64x32xf32>
    %8 = tpu.matmul %5, %7, %cst_6 {dimension_numbers = #tpu.dot_dimension_numbers<[1], [0], [0], [1], [0, 0, 1, 1], [], []>} : vector<64x32xbf16>, vector<32x32xbf16>, vector<64x32xf32> -> vector<64x32xf32>
    %9 = arith.addf %0, %8 : vector<64x32xf32>
    %c0_7 = arith.constant 0 : index
    %c0_8 = arith.constant 0 : index
    %c1 = arith.constant 1 : index
    %c0_9 = arith.constant 0 : index
    %10 = vector.load %arg1[%c0_7, %c0_8, %c1, %c0_9] : memref<1x10x10x32xbf16, #tpu.memory_space<vmem>>, vector<1x8x8x32xbf16>
    %11 = vector.shape_cast %10 : vector<1x8x8x32xbf16> to vector<8x8x32xbf16>
    %12 = arith.extf %11 : vector<8x8x32xbf16> to vector<8x8x32xf32>
    %13 = vector.shape_cast %12 : vector<8x8x32xf32> to vector<64x32xf32>
    %14 = arith.truncf %13 : vector<64x32xf32> to vector<64x32xbf16>
    %c1_10 = arith.constant 1 : index
    %c0_11 = arith.constant 0 : index
    %c0_12 = arith.constant 0 : index
    %15 = vector.load %arg2[%c1_10, %c0_11, %c0_12] : memref<9x32x32xbf16, #tpu.memory_space<vmem>>, vector<1x32x32xbf16>
    %16 = vector.shape_cast %15 : vector<1x32x32xbf16> to vector<32x32xbf16>
    %cst_13 = arith.constant dense<0.000000e+00> : vector<64x32xf32>
    %17 = tpu.matmul %14, %16, %cst_13 {dimension_numbers = #tpu.dot_dimension_numbers<[1], [0], [0], [1], [0, 0, 1, 1], [], []>} : vector<64x32xbf16>, vector<32x32xbf16>, vector<64x32xf32> -> vector<64x32xf32>
    %18 = arith.addf %9, %17 : vector<64x32xf32>
    %c0_14 = arith.constant 0 : index
    %c0_15 = arith.constant 0 : index
    %c2 = arith.constant 2 : index
    %c0_16 = arith.constant 0 : index
    %19 = vector.load %arg1[%c0_14, %c0_15, %c2, %c0_16] : memref<1x10x10x32xbf16, #tpu.memory_space<vmem>>, vector<1x8x8x32xbf16>
    %20 = vector.shape_cast %19 : vector<1x8x8x32xbf16> to vector<8x8x32xbf16>
    %21 = arith.extf %20 : vector<8x8x32xbf16> to vector<8x8x32xf32>
    %22 = vector.shape_cast %21 : vector<8x8x32xf32> to vector<64x32xf32>
    %23 = arith.truncf %22 : vector<64x32xf32> to vector<64x32xbf16>
    %c2_17 = arith.constant 2 : index
    %c0_18 = arith.constant 0 : index
    %c0_19 = arith.constant 0 : index
    %24 = vector.load %arg2[%c2_17, %c0_18, %c0_19] : memref<9x32x32xbf16, #tpu.memory_space<vmem>>, vector<1x32x32xbf16>
    %25 = vector.shape_cast %24 : vector<1x32x32xbf16> to vector<32x32xbf16>
    %cst_20 = arith.constant dense<0.000000e+00> : vector<64x32xf32>
    %26 = tpu.matmul %23, %25, %cst_20 {dimension_numbers = #tpu.dot_dimension_numbers<[1], [0], [0], [1], [0, 0, 1, 1], [], []>} : vector<64x32xbf16>, vector<32x32xbf16>, vector<64x32xf32> -> vector<64x32xf32>
    %27 = arith.addf %18, %26 : vector<64x32xf32>
    %c0_21 = arith.constant 0 : index
    %c1_22 = arith.constant 1 : index
    %c0_23 = arith.constant 0 : index
    %c0_24 = arith.constant 0 : index
    %28 = vector.load %arg1[%c0_21, %c1_22, %c0_23, %c0_24] : memref<1x10x10x32xbf16, #tpu.memory_space<vmem>>, vector<1x8x8x32xbf16>
    %29 = vector.shape_cast %28 : vector<1x8x8x32xbf16> to vector<8x8x32xbf16>
    %30 = arith.extf %29 : vector<8x8x32xbf16> to vector<8x8x32xf32>
    %31 = vector.shape_cast %30 : vector<8x8x32xf32> to vector<64x32xf32>
    %32 = arith.truncf %31 : vector<64x32xf32> to vector<64x32xbf16>
    %c3 = arith.constant 3 : index
    %c0_25 = arith.constant 0 : index
    %c0_26 = arith.constant 0 : index
    %33 = vector.load %arg2[%c3, %c0_25, %c0_26] : memref<9x32x32xbf16, #tpu.memory_space<vmem>>, vector<1x32x32xbf16>
    %34 = vector.shape_cast %33 : vector<1x32x32xbf16> to vector<32x32xbf16>
    %cst_27 = arith.constant dense<0.000000e+00> : vector<64x32xf32>
    %35 = tpu.matmul %32, %34, %cst_27 {dimension_numbers = #tpu.dot_dimension_numbers<[1], [0], [0], [1], [0, 0, 1, 1], [], []>} : vector<64x32xbf16>, vector<32x32xbf16>, vector<64x32xf32> -> vector<64x32xf32>
    %36 = arith.addf %27, %35 : vector<64x32xf32>
    %c0_28 = arith.constant 0 : index
    %c1_29 = arith.constant 1 : index
    %c1_30 = arith.constant 1 : index
    %c0_31 = arith.constant 0 : index
    %37 = vector.load %arg1[%c0_28, %c1_29, %c1_30, %c0_31] : memref<1x10x10x32xbf16, #tpu.memory_space<vmem>>, vector<1x8x8x32xbf16>
    %38 = vector.shape_cast %37 : vector<1x8x8x32xbf16> to vector<8x8x32xbf16>
    %39 = arith.extf %38 : vector<8x8x32xbf16> to vector<8x8x32xf32>
    %40 = vector.shape_cast %39 : vector<8x8x32xf32> to vector<64x32xf32>
    %41 = arith.truncf %40 : vector<64x32xf32> to vector<64x32xbf16>
    %c4 = arith.constant 4 : index
    %c0_32 = arith.constant 0 : index
    %c0_33 = arith.constant 0 : index
    %42 = vector.load %arg2[%c4, %c0_32, %c0_33] : memref<9x32x32xbf16, #tpu.memory_space<vmem>>, vector<1x32x32xbf16>
    %43 = vector.shape_cast %42 : vector<1x32x32xbf16> to vector<32x32xbf16>
    %cst_34 = arith.constant dense<0.000000e+00> : vector<64x32xf32>
    %44 = tpu.matmul %41, %43, %cst_34 {dimension_numbers = #tpu.dot_dimension_numbers<[1], [0], [0], [1], [0, 0, 1, 1], [], []>} : vector<64x32xbf16>, vector<32x32xbf16>, vector<64x32xf32> -> vector<64x32xf32>
    %45 = arith.addf %36, %44 : vector<64x32xf32>
    %c0_35 = arith.constant 0 : index
    %c1_36 = arith.constant 1 : index
    %c2_37 = arith.constant 2 : index
    %c0_38 = arith.constant 0 : index
    %46 = vector.load %arg1[%c0_35, %c1_36, %c2_37, %c0_38] : memref<1x10x10x32xbf16, #tpu.memory_space<vmem>>, vector<1x8x8x32xbf16>
    %47 = vector.shape_cast %46 : vector<1x8x8x32xbf16> to vector<8x8x32xbf16>
    %48 = arith.extf %47 : vector<8x8x32xbf16> to vector<8x8x32xf32>
    %49 = vector.shape_cast %48 : vector<8x8x32xf32> to vector<64x32xf32>
    %50 = arith.truncf %49 : vector<64x32xf32> to vector<64x32xbf16>
    %c5 = arith.constant 5 : index
    %c0_39 = arith.constant 0 : index
    %c0_40 = arith.constant 0 : index
    %51 = vector.load %arg2[%c5, %c0_39, %c0_40] : memref<9x32x32xbf16, #tpu.memory_space<vmem>>, vector<1x32x32xbf16>
    %52 = vector.shape_cast %51 : vector<1x32x32xbf16> to vector<32x32xbf16>
    %cst_41 = arith.constant dense<0.000000e+00> : vector<64x32xf32>
    %53 = tpu.matmul %50, %52, %cst_41 {dimension_numbers = #tpu.dot_dimension_numbers<[1], [0], [0], [1], [0, 0, 1, 1], [], []>} : vector<64x32xbf16>, vector<32x32xbf16>, vector<64x32xf32> -> vector<64x32xf32>
    %54 = arith.addf %45, %53 : vector<64x32xf32>
    %c0_42 = arith.constant 0 : index
    %c2_43 = arith.constant 2 : index
    %c0_44 = arith.constant 0 : index
    %c0_45 = arith.constant 0 : index
    %55 = vector.load %arg1[%c0_42, %c2_43, %c0_44, %c0_45] : memref<1x10x10x32xbf16, #tpu.memory_space<vmem>>, vector<1x8x8x32xbf16>
    %56 = vector.shape_cast %55 : vector<1x8x8x32xbf16> to vector<8x8x32xbf16>
    %57 = arith.extf %56 : vector<8x8x32xbf16> to vector<8x8x32xf32>
    %58 = vector.shape_cast %57 : vector<8x8x32xf32> to vector<64x32xf32>
    %59 = arith.truncf %58 : vector<64x32xf32> to vector<64x32xbf16>
    %c6 = arith.constant 6 : index
    %c0_46 = arith.constant 0 : index
    %c0_47 = arith.constant 0 : index
    %60 = vector.load %arg2[%c6, %c0_46, %c0_47] : memref<9x32x32xbf16, #tpu.memory_space<vmem>>, vector<1x32x32xbf16>
    %61 = vector.shape_cast %60 : vector<1x32x32xbf16> to vector<32x32xbf16>
    %cst_48 = arith.constant dense<0.000000e+00> : vector<64x32xf32>
    %62 = tpu.matmul %59, %61, %cst_48 {dimension_numbers = #tpu.dot_dimension_numbers<[1], [0], [0], [1], [0, 0, 1, 1], [], []>} : vector<64x32xbf16>, vector<32x32xbf16>, vector<64x32xf32> -> vector<64x32xf32>
    %63 = arith.addf %54, %62 : vector<64x32xf32>
    %c0_49 = arith.constant 0 : index
    %c2_50 = arith.constant 2 : index
    %c1_51 = arith.constant 1 : index
    %c0_52 = arith.constant 0 : index
    %64 = vector.load %arg1[%c0_49, %c2_50, %c1_51, %c0_52] : memref<1x10x10x32xbf16, #tpu.memory_space<vmem>>, vector<1x8x8x32xbf16>
    %65 = vector.shape_cast %64 : vector<1x8x8x32xbf16> to vector<8x8x32xbf16>
    %66 = arith.extf %65 : vector<8x8x32xbf16> to vector<8x8x32xf32>
    %67 = vector.shape_cast %66 : vector<8x8x32xf32> to vector<64x32xf32>
    %68 = arith.truncf %67 : vector<64x32xf32> to vector<64x32xbf16>
    %c7 = arith.constant 7 : index
    %c0_53 = arith.constant 0 : index
    %c0_54 = arith.constant 0 : index
    %69 = vector.load %arg2[%c7, %c0_53, %c0_54] : memref<9x32x32xbf16, #tpu.memory_space<vmem>>, vector<1x32x32xbf16>
    %70 = vector.shape_cast %69 : vector<1x32x32xbf16> to vector<32x32xbf16>
    %cst_55 = arith.constant dense<0.000000e+00> : vector<64x32xf32>
    %71 = tpu.matmul %68, %70, %cst_55 {dimension_numbers = #tpu.dot_dimension_numbers<[1], [0], [0], [1], [0, 0, 1, 1], [], []>} : vector<64x32xbf16>, vector<32x32xbf16>, vector<64x32xf32> -> vector<64x32xf32>
    %72 = arith.addf %63, %71 : vector<64x32xf32>
    %c0_56 = arith.constant 0 : index
    %c2_57 = arith.constant 2 : index
    %c2_58 = arith.constant 2 : index
    %c0_59 = arith.constant 0 : index
    %73 = vector.load %arg1[%c0_56, %c2_57, %c2_58, %c0_59] : memref<1x10x10x32xbf16, #tpu.memory_space<vmem>>, vector<1x8x8x32xbf16>
    %74 = vector.shape_cast %73 : vector<1x8x8x32xbf16> to vector<8x8x32xbf16>
    %75 = arith.extf %74 : vector<8x8x32xbf16> to vector<8x8x32xf32>
    %76 = vector.shape_cast %75 : vector<8x8x32xf32> to vector<64x32xf32>
    %77 = arith.truncf %76 : vector<64x32xf32> to vector<64x32xbf16>
    %c8 = arith.constant 8 : index
    %c0_60 = arith.constant 0 : index
    %c0_61 = arith.constant 0 : index
    %78 = vector.load %arg2[%c8, %c0_60, %c0_61] : memref<9x32x32xbf16, #tpu.memory_space<vmem>>, vector<1x32x32xbf16>
    %79 = vector.shape_cast %78 : vector<1x32x32xbf16> to vector<32x32xbf16>
    %cst_62 = arith.constant dense<0.000000e+00> : vector<64x32xf32>
    %80 = tpu.matmul %77, %79, %cst_62 {dimension_numbers = #tpu.dot_dimension_numbers<[1], [0], [0], [1], [0, 0, 1, 1], [], []>} : vector<64x32xbf16>, vector<32x32xbf16>, vector<64x32xf32> -> vector<64x32xf32>
    %81 = arith.addf %72, %80 : vector<64x32xf32>
    %c0_63 = arith.constant 0 : index
    %c0_64 = arith.constant 0 : index
    %82 = vector.load %arg3[%c0_63, %c0_64] : memref<1x32xf32, #tpu.memory_space<vmem>>, vector<1x32xf32>
    %83 = vector.broadcast %82 : vector<1x32xf32> to vector<64x32xf32>
    %84 = arith.mulf %81, %83 : vector<64x32xf32>
    %c0_65 = arith.constant 0 : index
    %c0_66 = arith.constant 0 : index
    %85 = vector.load %arg4[%c0_65, %c0_66] : memref<1x32xf32, #tpu.memory_space<vmem>>, vector<1x32xf32>
    %86 = vector.broadcast %85 : vector<1x32xf32> to vector<64x32xf32>
    %87 = arith.addf %84, %86 : vector<64x32xf32>
    %cst_67 = arith.constant 0.000000e+00 : f32
    %88 = vector.broadcast %cst_67 : f32 to vector<64x32xf32>
    %89 = arith.maximumf %87, %88 : vector<64x32xf32>
    %90 = arith.truncf %89 : vector<64x32xf32> to vector<64x32xbf16>
    %c0_68 = arith.constant 0 : index
    %c0_69 = arith.constant 0 : index
    %c0_70 = arith.constant 0 : index
    %91 = vector.load %arg5[%c0_68, %c0_69, %c0_70] : memref<1x64x32xbf16, #tpu.memory_space<vmem>>, vector<1x64x32xbf16>
    %92 = vector.shape_cast %91 : vector<1x64x32xbf16> to vector<64x32xbf16>
    %93 = vector.shape_cast %90 : vector<64x32xbf16> to vector<1x64x32xbf16>
    tpu.vector_store %arg5[%c0_68, %c0_69, %c0_70], %93 {strides = array<i32>} : memref<1x64x32xbf16, #tpu.memory_space<vmem>>, vector<1x64x32xbf16>,
    return
  }
  func.func @transform_0(%arg0: i32) -> (i32, i32, i32, i32) {
    %c0_i32 = arith.constant 0 : i32
    %c0_i32_0 = arith.constant 0 : i32
    %c0_i32_1 = arith.constant 0 : i32
    %c0_i32_2 = arith.constant 0 : i32
    return %arg0, %c0_i32, %c0_i32_0, %c0_i32_1 : i32, i32, i32, i32
  }
  func.func @transform_1(%arg0: i32) -> (i32, i32, i32) {
    %c0_i32 = arith.constant 0 : i32
    %c0_i32_0 = arith.constant 0 : i32
    %c0_i32_1 = arith.constant 0 : i32
    %c0_i32_2 = arith.constant 0 : i32
    return %c0_i32, %c0_i32_0, %c0_i32_1 : i32, i32, i32
  }
  func.func @transform_2(%arg0: i32) -> (i32, i32) {
    %c0_i32 = arith.constant 0 : i32
    %c0_i32_0 = arith.constant 0 : i32
    %c0_i32_1 = arith.constant 0 : i32
    return %c0_i32, %c0_i32_0 : i32, i32
  }
  func.func @transform_3(%arg0: i32) -> (i32, i32) {
    %c0_i32 = arith.constant 0 : i32
    %c0_i32_0 = arith.constant 0 : i32
    %c0_i32_1 = arith.constant 0 : i32
    return %c0_i32, %c0_i32_0 : i32, i32
  }
  func.func @transform_4(%arg0: i32) -> (i32, i32, i32) {
    %c0_i32 = arith.constant 0 : i32
    %c0_i32_0 = arith.constant 0 : i32
    %c0_i32_1 = arith.constant 0 : i32
    return %arg0, %c0_i32, %c0_i32_0 : i32, i32, i32
  }
}

module attributes {stable_mosaic.version = 11 : i64} {
  func.func @_matmul_bn_act_kernel(%arg0: i32, %arg1: memref<64x64xbf16, #tpu.memory_space<vmem>>, %arg2: memref<64x128xbf16, #tpu.memory_space<vmem>>, %arg3: memref<1x128xf32, #tpu.memory_space<vmem>>, %arg4: memref<1x128xf32, #tpu.memory_space<vmem>>, %arg5: memref<64x128xbf16, #tpu.memory_space<vmem>>) attributes {dimension_semantics = [#tpu.dimension_semantics<parallel>], iteration_bounds = array<i64: 2>, scalar_prefetch = 0 : i64, scratch_operands = 0 : i64, tpu.core_type = #tpu.core_type<tc>, window_params = [{transform_indices = @transform_0, window_bounds = array<i64: 64, 64>}, {pipeline_mode = #tpu.pipeline_mode<synchronous>, transform_indices = @transform_1, window_bounds = array<i64: 64, 128>}, {pipeline_mode = #tpu.pipeline_mode<synchronous>, transform_indices = @transform_2, window_bounds = array<i64: 1, 128>}, {pipeline_mode = #tpu.pipeline_mode<synchronous>, transform_indices = @transform_3, window_bounds = array<i64: 1, 128>}, {transform_indices = @transform_4, window_bounds = array<i64: 64, 128>}]} {
    %c0 = arith.constant 0 : index
    %c0_0 = arith.constant 0 : index
    %0 = vector.load %arg1[%c0, %c0_0] : memref<64x64xbf16, #tpu.memory_space<vmem>>, vector<64x64xbf16>
    %c0_1 = arith.constant 0 : index
    %c0_2 = arith.constant 0 : index
    %1 = vector.load %arg2[%c0_1, %c0_2] : memref<64x128xbf16, #tpu.memory_space<vmem>>, vector<64x128xbf16>
    %cst = arith.constant dense<0.000000e+00> : vector<64x128xf32>
    %2 = tpu.matmul %0, %1, %cst {dimension_numbers = #tpu.dot_dimension_numbers<[1], [0], [0], [1], [0, 0, 1, 1], [], []>} : vector<64x64xbf16>, vector<64x128xbf16>, vector<64x128xf32> -> vector<64x128xf32>
    %c0_3 = arith.constant 0 : index
    %c0_4 = arith.constant 0 : index
    %3 = vector.load %arg3[%c0_3, %c0_4] : memref<1x128xf32, #tpu.memory_space<vmem>>, vector<1x128xf32>
    %4 = vector.broadcast %3 : vector<1x128xf32> to vector<64x128xf32>
    %5 = arith.mulf %2, %4 : vector<64x128xf32>
    %c0_5 = arith.constant 0 : index
    %c0_6 = arith.constant 0 : index
    %6 = vector.load %arg4[%c0_5, %c0_6] : memref<1x128xf32, #tpu.memory_space<vmem>>, vector<1x128xf32>
    %7 = vector.broadcast %6 : vector<1x128xf32> to vector<64x128xf32>
    %8 = arith.addf %5, %7 : vector<64x128xf32>
    %cst_7 = arith.constant 0.000000e+00 : f32
    %9 = vector.broadcast %cst_7 : f32 to vector<64x128xf32>
    %10 = arith.maximumf %8, %9 : vector<64x128xf32>
    %11 = arith.truncf %10 : vector<64x128xf32> to vector<64x128xbf16>
    %c0_8 = arith.constant 0 : index
    %c0_9 = arith.constant 0 : index
    %12 = vector.load %arg5[%c0_8, %c0_9] : memref<64x128xbf16, #tpu.memory_space<vmem>>, vector<64x128xbf16>
    tpu.vector_store %arg5[%c0_8, %c0_9], %11 {strides = array<i32>} : memref<64x128xbf16, #tpu.memory_space<vmem>>, vector<64x128xbf16>,
    return
  }
  func.func @transform_0(%arg0: i32) -> (i32, i32) {
    %c0_i32 = arith.constant 0 : i32
    %c0_i32_0 = arith.constant 0 : i32
    return %arg0, %c0_i32 : i32, i32
  }
  func.func @transform_1(%arg0: i32) -> (i32, i32) {
    %c0_i32 = arith.constant 0 : i32
    %c0_i32_0 = arith.constant 0 : i32
    %c0_i32_1 = arith.constant 0 : i32
    return %c0_i32, %c0_i32_0 : i32, i32
  }
  func.func @transform_2(%arg0: i32) -> (i32, i32) {
    %c0_i32 = arith.constant 0 : i32
    %c0_i32_0 = arith.constant 0 : i32
    %c0_i32_1 = arith.constant 0 : i32
    return %c0_i32, %c0_i32_0 : i32, i32
  }
  func.func @transform_3(%arg0: i32) -> (i32, i32) {
    %c0_i32 = arith.constant 0 : i32
    %c0_i32_0 = arith.constant 0 : i32
    %c0_i32_1 = arith.constant 0 : i32
    return %c0_i32, %c0_i32_0 : i32, i32
  }
  func.func @transform_4(%arg0: i32) -> (i32, i32) {
    %c0_i32 = arith.constant 0 : i32
    %c0_i32_0 = arith.constant 0 : i32
    return %arg0, %c0_i32 : i32, i32
  }
}

module attributes {stable_mosaic.version = 11 : i64} {
  func.func @_matmul_bn_act_kernel(%arg0: i32, %arg1: memref<64x64xbf16, #tpu.memory_space<vmem>>, %arg2: memref<64x128xbf16, #tpu.memory_space<vmem>>, %arg3: memref<1x128xf32, #tpu.memory_space<vmem>>, %arg4: memref<1x128xf32, #tpu.memory_space<vmem>>, %arg5: memref<64x128xf32, #tpu.memory_space<vmem>>) attributes {dimension_semantics = [#tpu.dimension_semantics<parallel>], iteration_bounds = array<i64: 2>, scalar_prefetch = 0 : i64, scratch_operands = 0 : i64, tpu.core_type = #tpu.core_type<tc>, window_params = [{transform_indices = @transform_0, window_bounds = array<i64: 64, 64>}, {pipeline_mode = #tpu.pipeline_mode<synchronous>, transform_indices = @transform_1, window_bounds = array<i64: 64, 128>}, {pipeline_mode = #tpu.pipeline_mode<synchronous>, transform_indices = @transform_2, window_bounds = array<i64: 1, 128>}, {pipeline_mode = #tpu.pipeline_mode<synchronous>, transform_indices = @transform_3, window_bounds = array<i64: 1, 128>}, {transform_indices = @transform_4, window_bounds = array<i64: 64, 128>}]} {
    %c0 = arith.constant 0 : index
    %c0_0 = arith.constant 0 : index
    %0 = vector.load %arg1[%c0, %c0_0] : memref<64x64xbf16, #tpu.memory_space<vmem>>, vector<64x64xbf16>
    %c0_1 = arith.constant 0 : index
    %c0_2 = arith.constant 0 : index
    %1 = vector.load %arg2[%c0_1, %c0_2] : memref<64x128xbf16, #tpu.memory_space<vmem>>, vector<64x128xbf16>
    %cst = arith.constant dense<0.000000e+00> : vector<64x128xf32>
    %2 = tpu.matmul %0, %1, %cst {dimension_numbers = #tpu.dot_dimension_numbers<[1], [0], [0], [1], [0, 0, 1, 1], [], []>} : vector<64x64xbf16>, vector<64x128xbf16>, vector<64x128xf32> -> vector<64x128xf32>
    %c0_3 = arith.constant 0 : index
    %c0_4 = arith.constant 0 : index
    %3 = vector.load %arg3[%c0_3, %c0_4] : memref<1x128xf32, #tpu.memory_space<vmem>>, vector<1x128xf32>
    %4 = vector.broadcast %3 : vector<1x128xf32> to vector<64x128xf32>
    %5 = arith.mulf %2, %4 : vector<64x128xf32>
    %c0_5 = arith.constant 0 : index
    %c0_6 = arith.constant 0 : index
    %6 = vector.load %arg4[%c0_5, %c0_6] : memref<1x128xf32, #tpu.memory_space<vmem>>, vector<1x128xf32>
    %7 = vector.broadcast %6 : vector<1x128xf32> to vector<64x128xf32>
    %8 = arith.addf %5, %7 : vector<64x128xf32>
    %c0_7 = arith.constant 0 : index
    %c0_8 = arith.constant 0 : index
    %9 = vector.load %arg5[%c0_7, %c0_8] : memref<64x128xf32, #tpu.memory_space<vmem>>, vector<64x128xf32>
    tpu.vector_store %arg5[%c0_7, %c0_8], %8 {strides = array<i32>} : memref<64x128xf32, #tpu.memory_space<vmem>>, vector<64x128xf32>,
    return
  }
  func.func @transform_0(%arg0: i32) -> (i32, i32) {
    %c0_i32 = arith.constant 0 : i32
    %c0_i32_0 = arith.constant 0 : i32
    return %arg0, %c0_i32 : i32, i32
  }
  func.func @transform_1(%arg0: i32) -> (i32, i32) {
    %c0_i32 = arith.constant 0 : i32
    %c0_i32_0 = arith.constant 0 : i32
    %c0_i32_1 = arith.constant 0 : i32
    return %c0_i32, %c0_i32_0 : i32, i32
  }
  func.func @transform_2(%arg0: i32) -> (i32, i32) {
    %c0_i32 = arith.constant 0 : i32
    %c0_i32_0 = arith.constant 0 : i32
    %c0_i32_1 = arith.constant 0 : i32
    return %c0_i32, %c0_i32_0 : i32, i32
  }
  func.func @transform_3(%arg0: i32) -> (i32, i32) {
    %c0_i32 = arith.constant 0 : i32
    %c0_i32_0 = arith.constant 0 : i32
    %c0_i32_1 = arith.constant 0 : i32
    return %c0_i32, %c0_i32_0 : i32, i32
  }
  func.func @transform_4(%arg0: i32) -> (i32, i32) {
    %c0_i32 = arith.constant 0 : i32
    %c0_i32_0 = arith.constant 0 : i32
    return %arg0, %c0_i32 : i32, i32
  }
}

module attributes {stable_mosaic.version = 11 : i64} {
  func.func @_tail_id_kernel(%arg0: i32, %arg1: memref<1x64x64xbf16, #tpu.memory_space<vmem>>, %arg2: memref<1x1x64xf32, #tpu.memory_space<vmem>>, %arg3: memref<1x64x64xbf16, #tpu.memory_space<vmem>>, %arg4: memref<1x64x64xbf16, #tpu.memory_space<vmem>>) attributes {dimension_semantics = [#tpu.dimension_semantics<parallel>], iteration_bounds = array<i64: 2>, scalar_prefetch = 0 : i64, scratch_operands = 0 : i64, tpu.core_type = #tpu.core_type<tc>, window_params = [{transform_indices = @transform_0, window_bounds = array<i64: 1, 64, 64>}, {transform_indices = @transform_1, window_bounds = array<i64: 1, 1, 64>}, {transform_indices = @transform_2, window_bounds = array<i64: 1, 64, 64>}, {transform_indices = @transform_3, window_bounds = array<i64: 1, 64, 64>}]} {
    %c0 = arith.constant 0 : index
    %c0_0 = arith.constant 0 : index
    %c0_1 = arith.constant 0 : index
    %0 = vector.load %arg3[%c0, %c0_0, %c0_1] : memref<1x64x64xbf16, #tpu.memory_space<vmem>>, vector<1x64x64xbf16>
    %1 = vector.shape_cast %0 : vector<1x64x64xbf16> to vector<64x64xbf16>
    %2 = arith.extf %1 : vector<64x64xbf16> to vector<64x64xf32>
    %c0_2 = arith.constant 0 : index
    %c0_3 = arith.constant 0 : index
    %c0_4 = arith.constant 0 : index
    %3 = vector.load %arg1[%c0_2, %c0_3, %c0_4] : memref<1x64x64xbf16, #tpu.memory_space<vmem>>, vector<1x64x64xbf16>
    %4 = vector.shape_cast %3 : vector<1x64x64xbf16> to vector<64x64xbf16>
    %5 = arith.extf %4 : vector<64x64xbf16> to vector<64x64xf32>
    %c0_5 = arith.constant 0 : index
    %c0_6 = arith.constant 0 : index
    %c0_7 = arith.constant 0 : index
    %6 = vector.load %arg2[%c0_5, %c0_6, %c0_7] : memref<1x1x64xf32, #tpu.memory_space<vmem>>, vector<1x1x64xf32>
    %7 = vector.shape_cast %6 : vector<1x1x64xf32> to vector<1x64xf32>
    %8 = vector.broadcast %7 : vector<1x64xf32> to vector<64x64xf32>
    %9 = arith.mulf %5, %8 : vector<64x64xf32>
    %10 = arith.addf %2, %9 : vector<64x64xf32>
    %cst = arith.constant 3.000000e+00 : f32
    %11 = vector.broadcast %cst : f32 to vector<64x64xf32>
    %12 = arith.addf %10, %11 : vector<64x64xf32>
    %cst_8 = arith.constant 0.000000e+00 : f32
    %cst_9 = arith.constant 6.000000e+00 : f32
    %13 = vector.broadcast %cst_8 : f32 to vector<64x64xf32>
    %14 = arith.maximumf %13, %12 : vector<64x64xf32>
    %15 = vector.broadcast %cst_9 : f32 to vector<64x64xf32>
    %16 = arith.minimumf %15, %14 : vector<64x64xf32>
    %17 = arith.mulf %10, %16 : vector<64x64xf32>
    %cst_10 = arith.constant 0.166666672 : f32
    %18 = vector.broadcast %cst_10 : f32 to vector<64x64xf32>
    %19 = arith.mulf %17, %18 : vector<64x64xf32>
    %20 = arith.truncf %19 : vector<64x64xf32> to vector<64x64xbf16>
    %c0_11 = arith.constant 0 : index
    %c0_12 = arith.constant 0 : index
    %c0_13 = arith.constant 0 : index
    %21 = vector.load %arg4[%c0_11, %c0_12, %c0_13] : memref<1x64x64xbf16, #tpu.memory_space<vmem>>, vector<1x64x64xbf16>
    %22 = vector.shape_cast %21 : vector<1x64x64xbf16> to vector<64x64xbf16>
    %23 = vector.shape_cast %20 : vector<64x64xbf16> to vector<1x64x64xbf16>
    tpu.vector_store %arg4[%c0_11, %c0_12, %c0_13], %23 {strides = array<i32>} : memref<1x64x64xbf16, #tpu.memory_space<vmem>>, vector<1x64x64xbf16>,
    return
  }
  func.func @transform_0(%arg0: i32) -> (i32, i32, i32) {
    %c0_i32 = arith.constant 0 : i32
    %c0_i32_0 = arith.constant 0 : i32
    %c0_i32_1 = arith.constant 0 : i32
    return %arg0, %c0_i32, %c0_i32_0 : i32, i32, i32
  }
  func.func @transform_1(%arg0: i32) -> (i32, i32, i32) {
    %c0_i32 = arith.constant 0 : i32
    %c0_i32_0 = arith.constant 0 : i32
    %c0_i32_1 = arith.constant 0 : i32
    return %arg0, %c0_i32, %c0_i32_0 : i32, i32, i32
  }
  func.func @transform_2(%arg0: i32) -> (i32, i32, i32) {
    %c0_i32 = arith.constant 0 : i32
    %c0_i32_0 = arith.constant 0 : i32
    %c0_i32_1 = arith.constant 0 : i32
    return %arg0, %c0_i32, %c0_i32_0 : i32, i32, i32
  }
  func.func @transform_3(%arg0: i32) -> (i32, i32, i32) {
    %c0_i32 = arith.constant 0 : i32
    %c0_i32_0 = arith.constant 0 : i32
    %c0_i32_1 = arith.constant 0 : i32
    return %arg0, %c0_i32, %c0_i32_0 : i32, i32, i32
  }
}

</mosaic_0001>

<bundles_post_ra>
// kernel: _lambda_.9
= control target key start
LH: loop header
LB: loop body
LE: loop exit
PB: predicated region body
PF: predicated region fallthrough
CT: control target
= control target key end

     0   :  { %s574_s15 = smov 0   ;;  %s607_s0 = inlined_call_operand.vmem [shape: bf16[128,16], index: 0, kind: input, shape index: {}]   ;;  %s608_s1 = inlined_call_operand.vmem [shape: bf16[16,128], index: 1, kind: input, shape index: {}]   ;;  %s609_s2 = inlined_call_operand.vmem [shape: f32[1,128], index: 2, kind: input, shape index: {}]   ;;  %s610_s3 = inlined_call_operand.vmem [shape: f32[1,128], index: 3, kind: input, shape index: {}]   ;;  %s611_s4 = inlined_call_operand.vmem [shape: bf16[128,128], index: 4, kind: output, shape index: {}]  }
   0x1 LB: > { %s450_s16 = sadd.s32 4294967295, %s547_s15   ;;  %p454_p0 = scmp.ge.s32.totalorder %s547_s15, 1  ;;  %s547_s15 = sphi %s574_s15, %s14_s15  }
   0x2   : > { %p163_p1 = scmp.lt.s32.totalorder %s547_s15, 3 }
   0x4   : > { %p164_p2 = pnand %p454_p0, %p163_p1 }
   0x5   : > { %v536_v0 = vld [vmem:[%s608_s1] sm:$0xff] (!%p164_p2)   ;;  %s455_s19 = sshll.u32 (!%p164_p2), %s450_s16, 3  ;;  %vm238_vm0 = vcmask (!%p164_p2), 130048  }
   0x6   : > { %167 = sbr.rel (%p164_p2) target bundleno = 242 (0xf2), region = 36  ;;  %p190_p3 = scmp.lt.s32.totalorder (!%p164_p2), %s455_s19, 15  ;;  %516 = vmatprep.subr.bf16.mxu0 (!%p164_p2), %v536_v0  ;;  %526 = vmatprep.subr.bf16.mxu1 (!%p164_p2), %v536_v0  ;;  %v468_v5 = vld [vmem:[%s609_s2] ss:$0 sm:$0xff] (!%p164_p2) }
   0x7   : > { %517 = vmatpush3.bf16.msra.mxu0 (!%p164_p2), %v536_v0  ;;  %527 = vmatpush3.bf16.msra.mxu1 (!%p164_p2), %v536_v0  ;;  %v469_v7 = vld [vmem:[%s610_s3] ss:$0 sm:$0xff] (!%p164_p2) }
   0xd   : > { %s613_s19 = smov (!%p190_p3, %s455_s19), 15 }
   0xe   : > { %s456_s20 = sshll.u32 %s613_s19, 2 }
   0xf   : > { %s193_s23 = scalar_lea.vmem %s607_s0, %s456_s20  ;;  %s199_s30 = scalar_lea.vmem %s611_s4, %s456_s20 }
  0x10   : > { %v537_v1 = vld [vmem:[%s193_s23] sm:$0xff]   ;;  %v538_v2 = vld [vmem:[%s193_s23 + $0x10] sm:$0xff]   ;;  %v539_v3 = vld [vmem:[%s193_s23 + $0x8] sm:$0xff]  }
  0x11   : > { %518 = vmatprep.mubr.msk.bf16.mxu0 %vm238_vm0, %v537_v1  ;;  %522 = vmatprep.mubr.msk.bf16.mxu1 %vm238_vm0, %v538_v2  ;;  %v540_v4 = vld [vmem:[%s193_s23 + $0x18] sm:$0xff]  }
  0x12   : > { %519 = vmatmul.mubr.msk.bf16.vlgmr.msra.gmra.mrb[0].mxu0 %vm238_vm0, %v539_v3  ;;  %523 = vmatmul.mubr.msk.bf16.vlgmr.msra.gmra.mrb[0].mxu1 %vm238_vm0, %v540_v4 }
  0xe5   : > { %v520_v6 = vpop.f32.mrb[0].mxu0  ;;  %v524_v9 = vpop.f32.mrb[0].mxu1 }
  0xe6   : > { %v325_v8 = vmul.f32 %v520_v6, %v468_v5  ;;  %v285_v10 = vpop.f32.mrb[1].mxu0  ;;  %v329_v11 = vmul.f32 %v524_v9, %v468_v5  ;;  %v301_v13 = vpop.f32.mrb[1].mxu1 }
  0xe7   : > { %v323_v12 = vmul.f32 %v468_v5, %v285_v10  ;;  %v521_v14 = vpop.f32.mrb[2].mxu0  ;;  %v327_v16 = vmul.f32 %v468_v5, %v301_v13  ;;  %v525_v18 = vpop.f32.mrb[2].mxu1 }
  0xe8   : > { %v340_v15 = vadd.f32 %v469_v7, %v325_v8  ;;  %v326_v17 = vmul.f32 %v521_v14, %v468_v5  ;;  %v288_v19 = vpop.f32.mrb[3].mxu0  ;;  %v344_v20 = vadd.f32 %v469_v7, %v329_v11  ;;  %v330_v22 = vmul.f32 %v525_v18, %v468_v5  ;;  %v304_v24 = vpop.f32.mrb[3].mxu1 }
  0xe9   : > { %v338_v21 = vadd.f32 %v469_v7, %v323_v12  ;;  %v324_v23 = vmul.f32 %v468_v5, %v288_v19  ;;  %v342_v25 = vadd.f32 %v469_v7, %v327_v16  ;;  %v328_v27 = vmul.f32 %v468_v5, %v304_v24 }
  0xea   : > { %v341_v26 = vadd.f32 %v469_v7, %v326_v17  ;;  %v345_v28 = vadd.f32 %v469_v7, %v330_v22  ;;  %v348_v30 = vmax.f32 %v340_v15, 0.0  ;;  %v352_v33 = vmax.f32 %v344_v20, 0.0 }
  0xeb   : > { %v339_v29 = vadd.f32 %v469_v7, %v324_v23  ;;  %v343_v32 = vadd.f32 %v469_v7, %v328_v27  ;;  %v346_v34 = vmax.f32 %v338_v21, 0.0  ;;  %v350_v37 = vmax.f32 %v342_v25, 0.0 }
  0xec   : > { %v349_v31 = vmax.f32 %v341_v26, 0.0  ;;  %v353_v35 = vmax.f32 %v345_v28, 0.0 }
  0xed   : > { %v347_v36 = vmax.f32 %v339_v29, 0.0  ;;  %v351_v39 = vmax.f32 %v343_v32, 0.0 }
  0xee   : > { %v496_v38 = vpack.c.bf16 %v349_v31, %v348_v30  ;;  %v506_v40 = vpack.c.bf16 %v353_v35, %v352_v33 }
  0xef   : > { %v491_v41 = vpack.c.bf16 %v347_v36, %v346_v34  ;;  %v501_v42 = vpack.c.bf16 %v351_v39, %v350_v37 }
  0xf0   : > { %508 = vst [vmem:[%s199_s30 + $0x8] sm:$0xff] %v496_v38   ;;  %510 = vst [vmem:[%s199_s30 + $0x18] sm:$0xff] %v506_v40  }
  0xf1   : > { %492 = vst [vmem:[%s199_s30] sm:$0xff] %v491_v41   ;;  %509 = vst [vmem:[%s199_s30 + $0x10] sm:$0xff] %v501_v42  }
  0xf2 PF: > { %s14_s15 = sadd.s32 1, %s547_s15  }
  0xf3   : > { %p11_p4 = scmp.ge.s32.totalorder %s14_s15, 4  }
  0xf5   :  { %13 = sbr.rel (!%p11_p4) target bundleno = 1 (0x1), region = 66 }

// kernel: _lambda_.12
= control target key start
LH: loop header
LB: loop body
LE: loop exit
PB: predicated region body
PF: predicated region fallthrough
CT: control target
= control target key end

     0   :  { %s763_s21 = smov 0   ;;  %s808_s0 = inlined_call_operand.vmem [shape: bf16[2,64,64], index: 0, kind: input, shape index: {}]   ;;  %s809_s1 = inlined_call_operand.vmem [shape: f32[2,1,64], index: 1, kind: input, shape index: {}]   ;;  %s810_s2 = inlined_call_operand.vmem [shape: bf16[2,64,16], index: 2, kind: input, shape index: {}]   ;;  %s811_s3 = inlined_call_operand.vmem [shape: bf16[16,64], index: 3, kind: input, shape index: {}]   ;;  %s812_s4 = inlined_call_operand.vmem [shape: f32[1,64], index: 4, kind: input, shape index: {}]   ;;  %s813_s5 = inlined_call_operand.vmem [shape: f32[1,64], index: 5, kind: input, shape index: {}]   ;;  %s814_s6 = inlined_call_operand.vmem [shape: bf16[2,64,64], index: 6, kind: output, shape index: {}]  }
   0x1 LB: > { %s627_s22 = sadd.s32 4294967295, %s726_s21   ;;  %p631_p0 = scmp.ge.s32.totalorder %s726_s21, 1  ;;  %s726_s21 = sphi %s763_s21, %s16_s21  }
   0x2   : > { %p230_p1 = scmp.lt.s32.totalorder %s726_s21, 3 }
   0x4   : > { %p231_p2 = pnand %p631_p0, %p230_p1 }
   0x5   : > { %v715_v0 = vld [vmem:[%s811_s3] sm:$0xff] (!%p231_p2)   ;;  %p268_p3 = scmp.lt.s32.totalorder (!%p231_p2), %s627_s22, 1  ;;  %vm323_vm0 = vcmask (!%p231_p2), 130048   ;;  %vm542_vm1 = vcmask (!%p231_p2), 519168  }
   0x6   : > { %234 = sbr.rel (%p231_p2) target bundleno = 252 (0xfc), region = 44  ;;  %695 = vmatprep.subr.bf16.mxu0 (!%p231_p2), %v715_v0  ;;  %705 = vmatprep.subr.bf16.mxu1 (!%p231_p2), %v715_v0  ;;  %v647_v26 = vld [vmem:[%s812_s4] ss:$0 sm:$0xff] (!%p231_p2) }
   0x7   : > { %696 = vmatpush3.bf16.msra.mxu0 (!%p231_p2), %v715_v0  ;;  %706 = vmatpush3.bf16.msra.mxu1 (!%p231_p2), %v715_v0  ;;  %v648_v28 = vld [vmem:[%s813_s5] ss:$0 sm:$0xff] (!%p231_p2) }
   0xd   : > { %s816_s22 = smov (!%p268_p3, %s627_s22), 1 }
   0xe   : > { %s774_s25 = sshll.u32 %s816_s22, 5  ;;  %s275_s10 = scalar_lea.vmem %s809_s1, %s816_s22 }
   0xf   : > { %s280_s28 = scalar_lea.vmem %s810_s2, %s774_s25  ;;  %s272_s7 = scalar_lea.vmem %s808_s0, %s774_s25  ;;  %v649_v11 = vld [vmem:[%s275_s10] ss:$0 sm:$0xff] }
  0x10   : > { %v716_v1 = vld [vmem:[%s280_s28] sm:$0xff]   ;;  %v717_v2 = vld [vmem:[%s280_s28 + $0x10] sm:$0xff]   ;;  %v718_v3 = vld [vmem:[%s280_s28 + $0x8] sm:$0xff]   ;;  %s285_s17 = scalar_lea.vmem %s814_s6, %s774_s25 }
  0x11   : > { %697 = vmatprep.mubr.msk.bf16.mxu0 %vm323_vm0, %v716_v1  ;;  %701 = vmatprep.mubr.msk.bf16.mxu1 %vm323_vm0, %v717_v2  ;;  %v719_v4 = vld [vmem:[%s280_s28 + $0x18] sm:$0xff]   ;;  %v687_v5 = vld [vmem:[%s272_s7 + $0x8] sm:$0xff]   ;;  %v672_v9 = vld [vmem:[%s272_s7] sm:$0xff]  }
  0x12   : > { %698 = vmatmul.mubr.msk.bf16.vlgmr.msra.gmra.mrb[0].mxu0 %vm323_vm0, %v718_v3  ;;  %702 = vmatmul.mubr.msk.bf16.vlgmr.msra.gmra.mrb[0].mxu1 %vm323_vm0, %v719_v4  ;;  %v689_v6 = vld [vmem:[%s272_s7 + $0x18] sm:$0xff]   ;;  %v677_v7 = vunpack.c.l.bf16 %v687_v5  ;;  %v688_v10 = vld [vmem:[%s272_s7 + $0x10] sm:$0xff]   ;;  %v673_v12 = vunpack.c.l.bf16 %v672_v9  ;;  %v678_v16 = vunpack.c.h.bf16 %v687_v5  ;;  %v674_v20 = vunpack.c.h.bf16 %v672_v9 }
  0x13   : > { %v685_v8 = vunpack.c.l.bf16 %v689_v6  ;;  %v681_v13 = vunpack.c.l.bf16 %v688_v10  ;;  %v686_v17 = vunpack.c.h.bf16 %v689_v6  ;;  %v682_v21 = vunpack.c.h.bf16 %v688_v10 }
  0x14   : > { %v456_v14 = vmul.f32 %v677_v7, %v649_v11  ;;  %v454_v18 = vmul.f32 %v673_v12, %v649_v11  ;;  %v457_v22 = vmul.f32 %v678_v16, %v649_v11  ;;  %v455_v24 = vmul.f32 %v674_v20, %v649_v11 }
  0x15   : > { %v460_v15 = vmul.f32 %v685_v8, %v649_v11  ;;  %v458_v19 = vmul.f32 %v681_v13, %v649_v11  ;;  %v461_v23 = vmul.f32 %v686_v17, %v649_v11  ;;  %v459_v25 = vmul.f32 %v682_v21, %v649_v11 }
  0xe5   : > { %v699_v27 = vpop.f32.mrb[0].mxu0  ;;  %v703_v30 = vpop.f32.mrb[0].mxu1 }
  0xe6   : > { %v410_v29 = vmul.f32 %v699_v27, %v647_v26  ;;  %v370_v31 = vpop.f32.mrb[1].mxu0  ;;  %v414_v32 = vmul.f32 %v703_v30, %v647_v26  ;;  %v386_v34 = vpop.f32.mrb[1].mxu1 }
  0xe7   : > { %v408_v33 = vmul.f32 %v647_v26, %v370_v31  ;;  %v700_v35 = vpop.f32.mrb[2].mxu0  ;;  %v412_v37 = vmul.f32 %v647_v26, %v386_v34  ;;  %v704_v39 = vpop.f32.mrb[2].mxu1 }
  0xe8   : > { %v425_v36 = vadd.f32 %v648_v28, %v410_v29  ;;  %v411_v38 = vmul.f32 %v700_v35, %v647_v26  ;;  %v373_v40 = vpop.f32.mrb[3].mxu0  ;;  %v429_v41 = vadd.f32 %v648_v28, %v414_v32  ;;  %v415_v43 = vmul.f32 %v704_v39, %v647_v26  ;;  %v389_v45 = vpop.f32.mrb[3].mxu1 }
  0xe9   : > { %v423_v42 = vadd.f32 %v648_v28, %v408_v33  ;;  %v409_v44 = vmul.f32 %v647_v26, %v373_v40  ;;  %v427_v47 = vadd.f32 %v648_v28, %v412_v37  ;;  %v413_v49 = vmul.f32 %v647_v26, %v389_v45 }
  0xea   : > { %v464_v46 = vadd.f32 %v456_v14, %v425_v36  ;;  %v426_v48 = vadd.f32 %v648_v28, %v411_v38  ;;  %v468_v50 = vadd.f32 %v460_v15, %v429_v41  ;;  %v430_v52 = vadd.f32 %v648_v28, %v415_v43 }
  0xeb   : > { %v462_v51 = vadd.f32 %v454_v18, %v423_v42  ;;  %v424_v53 = vadd.f32 %v648_v28, %v409_v44  ;;  %v466_v55 = vadd.f32 %v458_v19, %v427_v47  ;;  %v428_v57 = vadd.f32 %v648_v28, %v413_v49 }
  0xec   : > { %v472_v54 = vadd.f32 3.0, %v464_v46  ;;  %v465_v56 = vadd.f32 %v457_v22, %v426_v48  ;;  %v476_v58 = vadd.f32 3.0, %v468_v50  ;;  %v469_v60 = vadd.f32 %v461_v23, %v430_v52 }
  0xed   : > { %v470_v59 = vadd.f32 3.0, %v462_v51  ;;  %v463_v61 = vadd.f32 %v455_v24, %v424_v53  ;;  %v474_v63 = vadd.f32 3.0, %v466_v55  ;;  %v467_v1 = vadd.f32 %v459_v25, %v428_v57 }
  0xee   : > { %v480_v62 = vmax.f32 %v472_v54, 0.0  ;;  %v473_v0 = vadd.f32 3.0, %v465_v56  ;;  %v484_v2 = vmax.f32 %v476_v58, 0.0  ;;  %v477_v4 = vadd.f32 3.0, %v469_v60 }
  0xef   : > { %v478_v3 = vmax.f32 %v470_v59, 0.0  ;;  %v471_v5 = vadd.f32 3.0, %v463_v61  ;;  %v482_v7 = vmax.f32 %v474_v63, 0.0  ;;  %v475_v9 = vadd.f32 3.0, %v467_v1 }
  0xf0   : > { %v488_v6 = vmin.f32 %v480_v62, 6.0  ;;  %v481_v8 = vmax.f32 %v473_v0, 0.0  ;;  %v492_v10 = vmin.f32 %v484_v2, 6.0  ;;  %v485_v12 = vmax.f32 %v477_v4, 0.0 }
  0xf1   : > { %v486_v11 = vmin.f32 %v478_v3, 6.0  ;;  %v479_v13 = vmax.f32 %v471_v5, 0.0  ;;  %v490_v15 = vmin.f32 %v482_v7, 6.0  ;;  %v483_v17 = vmax.f32 %v475_v9, 0.0 }
  0xf2   : > { %v496_v14 = vmul.f32 %v488_v6, %v464_v46  ;;  %v489_v16 = vmin.f32 %v481_v8, 6.0  ;;  %v500_v18 = vmul.f32 %v492_v10, %v468_v50  ;;  %v493_v20 = vmin.f32 %v485_v12, 6.0 }
  0xf3   : > { %v494_v19 = vmul.f32 %v486_v11, %v462_v51  ;;  %v487_v21 = vmin.f32 %v479_v13, 6.0  ;;  %v498_v23 = vmul.f32 %v490_v15, %v466_v55  ;;  %v491_v25 = vmin.f32 %v483_v17, 6.0 }
  0xf4   : > { %v504_v22 = vmul.f32 0.16666667, %v496_v14  ;;  %v497_v24 = vmul.f32 %v489_v16, %v465_v56  ;;  %v508_v26 = vmul.f32 0.16666667, %v500_v18  ;;  %v501_v28 = vmul.f32 %v493_v20, %v469_v60 }
  0xf5   : > { %v502_v27 = vmul.f32 0.16666667, %v494_v19  ;;  %v495_v29 = vmul.f32 %v487_v21, %v463_v61  ;;  %v506_v31 = vmul.f32 0.16666667, %v498_v23  ;;  %v499_v33 = vmul.f32 %v491_v25, %v467_v1 }
  0xf6   : > { %v665_v30 = vpack.c.bf16 %v504_v22, %v504_v22  ;;  %v505_v32 = vmul.f32 0.16666667, %v497_v24  ;;  %v669_v34 = vpack.c.bf16 %v508_v26, %v508_v26  ;;  %v509_v36 = vmul.f32 0.16666667, %v501_v28 }
  0xf7   : > { %v663_v35 = vpack.c.bf16 %v502_v27, %v502_v27  ;;  %v503_v37 = vmul.f32 0.16666667, %v495_v29  ;;  %v667_v38 = vpack.c.bf16 %v506_v31, %v506_v31  ;;  %v507_v40 = vmul.f32 0.16666667, %v499_v33 }
  0xf8   : > { %545 = vst.msk [vmem:[%s285_s17 + $0x8] sm:$0xf] %vm542_vm1, %v665_v30  ;;  %v666_v39 = vpack.c.bf16 %v505_v32, %v505_v32  ;;  %549 = vst.msk [vmem:[%s285_s17 + $0x18] sm:$0xf] %vm542_vm1, %v669_v34  ;;  %v670_v41 = vpack.c.bf16 %v509_v36, %v509_v36 }
  0xf9   : > { %543 = vst.msk [vmem:[%s285_s17] sm:$0xf] %vm542_vm1, %v663_v35  ;;  %v664_v42 = vpack.c.bf16 %v503_v37, %v503_v37  ;;  %547 = vst.msk [vmem:[%s285_s17 + $0x10] sm:$0xf] %vm542_vm1, %v667_v38  ;;  %v668_v43 = vpack.c.bf16 %v507_v40, %v507_v40 }
  0xfa   : > { %546 = vst.msk [vmem:[%s285_s17 + $0xc] sm:$0xf] %vm542_vm1, %v666_v39  ;;  %550 = vst.msk [vmem:[%s285_s17 + $0x1c] sm:$0xf] %vm542_vm1, %v670_v41 }
  0xfb   : > { %544 = vst.msk [vmem:[%s285_s17 + $0x4] sm:$0xf] %vm542_vm1, %v664_v42  ;;  %548 = vst.msk [vmem:[%s285_s17 + $0x14] sm:$0xf] %vm542_vm1, %v668_v43 }
  0xfc PF: > { %s16_s21 = sadd.s32 1, %s726_s21  }
  0xfd   : > { %p13_p4 = scmp.ge.s32.totalorder %s16_s21, 4  }
  0xff   :  { %15 = sbr.rel (!%p13_p4) target bundleno = 1 (0x1), region = 80 }

// kernel: _lambda_.11
= control target key start
LH: loop header
LB: loop body
LE: loop exit
PB: predicated region body
PF: predicated region fallthrough
CT: control target
= control target key end

     0   :  { %s952_s30 = smov 0   ;;  %s1040_s0 = inlined_call_operand.vmem [shape: bf16[2,64,32], index: 0, kind: input, shape index: {}]   ;;  %s1041_s1 = inlined_call_operand.vmem [shape: bf16[32,64], index: 1, kind: input, shape index: {}]   ;;  %s1042_s2 = inlined_call_operand.vmem [shape: f32[1,64], index: 2, kind: input, shape index: {}]   ;;  %s1043_s3 = inlined_call_operand.vmem [shape: f32[1,64], index: 3, kind: input, shape index: {}]   ;;  %s1044_s4 = inlined_call_operand.vmem [shape: bf16[64,8], index: 4, kind: input, shape index: {}]   ;;  %s1045_s5 = inlined_call_operand.vmem [shape: f32[1,8], index: 5, kind: input, shape index: {}]   ;;  %s1046_s6 = inlined_call_operand.vmem [shape: bf16[8,64], index: 6, kind: input, shape index: {}]   ;;  %s1047_s7 = inlined_call_operand.vmem [shape: f32[1,64], index: 7, kind: input, shape index: {}]   ;;  %s1048_s8 = inlined_call_operand.vmem [shape: bf16[2,64,64], index: 8, kind: output, shape index: {0}]   ;;  %s1049_s9 = inlined_call_operand.vmem [shape: f32[2,1,64], index: 9, kind: output, shape index: {1}]  }
   0x1 LB: > { %s777_s10 = sadd.s32 4294967295, %s898_s30   ;;  %p781_p0 = scmp.ge.s32.totalorder %s898_s30, 1  ;;  %s898_s30 = sphi %s952_s30, %s20_s30  }
   0x2   : > { %p290_p1 = scmp.lt.s32.totalorder %s898_s30, 3 }
   0x4   : > { %p291_p2 = pnand %p781_p0, %p290_p1 }
   0x5   : > { %v878_v0 = vld [vmem:[%s1041_s1] sm:$0xff] (!%p291_p2)   ;;  %p329_p3 = scmp.lt.s32.totalorder (!%p291_p2), %s777_s10, 1  ;;  %v879_v1 = vld [vmem:[%s1041_s1 + $0x8] sm:$0xff] (!%p291_p2)   ;;  %vm387_vm0 = vcmask (!%p291_p2), 261120   ;;  %v900_v7 = vmov (!%p291_p2), 0.0   ;;  %vm901_vm1 = vmmov (!%p291_p2), 0  }
   0x6   : > { %294 = sbr.rel (%p291_p2) target bundleno = 727 (0x2d7), region = 52  ;;  %838 = vmatprep.subr.bf16.mxu0 (!%p291_p2), %v878_v0  ;;  %v884_v6 = vld [vmem:[%s1044_s4] sm:$0xff] (!%p291_p2)   ;;  %850 = vmatprep.subr.bf16.mxu1 (!%p291_p2), %v900_v7  ;;  %v885_v8 = vld [vmem:[%s1044_s4 + $0x8] sm:$0xff] (!%p291_p2)   ;;  %v886_v9 = vld [vmem:[%s1044_s4 + $0x10] sm:$0xff] (!%p291_p2)   ;;  %vm645_vm2 = vcmask (!%p291_p2), 1043456   ;;  %vm527_vm3 = vcmask (!%p291_p2), 519168  }
   0x7   : > { %839 = vmatpush3.bf16.msra.mxu0 (!%p291_p2), %v878_v0  ;;  %851 = vmatpush3.bf16.msra.mxu1 (!%p291_p2), %v884_v6  ;;  %v887_v10 = vld [vmem:[%s1044_s4 + $0x18] sm:$0xff] (!%p291_p2)   ;;  %v639_v11 = vld [vmem:[%s1046_s6] sm:$0xf] (!%p291_p2)  ;;  %vm536_vm4 = vcmask (!%p291_p2), 523264   ;;  %vm641_vm5 = vcmask (!%p291_p2), 64512   ;;  %vm695_vm6 = vcmask (!%p291_p2), 516096  }
   0x8   : > { %840 = vmatprep.subr.bf16.mxu0 (!%p291_p2), %v879_v1  ;;  %852 = vmatprep.subr.bf16.mxu1 (!%p291_p2), %v900_v7  ;;  %v647_v12 = vsel (!%p291_p2), %vm645_vm2, %v639_v11, 0  ;;  %v796_v13 = vld [vmem:[%s1042_s2] ss:$0 sm:$0xff] (!%p291_p2) }
   0x9   : > { %858 = vmatprep.mubr.msk.bf16.mxu1 (!%p291_p2), %vm901_vm1, %v900_v7  ;;  %v797_v15 = vld [vmem:[%s1043_s3] ss:$0 sm:$0xff] (!%p291_p2) }
   0xa   : > { %v569_v6 = vld [vmem:[%s1045_s5] sm:$0x1] (!%p291_p2) }
   0xb   : > { %841 = vmatpush3.bf16.msra.mxu0 (!%p291_p2), %v879_v1  ;;  %853 = vmatpush3.bf16.msra.mxu1 (!%p291_p2), %v885_v8 }
   0xc   : > { %862 = vmatprep.subr.bf16.mxu0 (!%p291_p2), %v900_v7  ;;  %854 = vmatprep.subr.bf16.mxu1 (!%p291_p2), %v900_v7 }
   0xd   : > { %s1051_s10 = smov (!%p329_p3, %s777_s10), 1 }
   0xe   : > { %s815_s15 = sshll.u32 %s1051_s10, 5  ;;  %s341_s23 = scalar_lea.vmem %s1049_s9, %s1051_s10 }
   0xf   : > { %s333_s18 = scalar_lea.vmem %s1040_s0, %s815_s15  ;;  %855 = vmatpush3.bf16.msra.mxu1 %v886_v9  ;;  %s1000_s17 = scalar_lea.vmem %s1048_s8, %s815_s15 }
  0x10   : > { %v880_v2 = vld [vmem:[%s333_s18] sm:$0xff]   ;;  %v881_v3 = vld [vmem:[%s333_s18 + $0x8] sm:$0xff]   ;;  %v882_v4 = vld [vmem:[%s333_s18 + $0x10] sm:$0xff]   ;;  %856 = vmatprep.subr.bf16.mxu1 %v900_v7 }
  0x11   : > { %842 = vmatprep.mubr.msk.bf16.mxu0 %vm387_vm0, %v880_v2  ;;  %v883_v5 = vld [vmem:[%s333_s18 + $0x18] sm:$0xff]  }
  0x12   : > { %843 = vmatmul.mubr.msk.bf16.vlgmr.msra.gmra.mrb[0].mxu0 %vm387_vm0, %v881_v3 }
  0x13   : > { %846 = vmatprep.mubr.msk.bf16.mxu0 %vm387_vm0, %v882_v4  ;;  %857 = vmatpush3.bf16.msra.mxu1 %v887_v10 }
  0x14   : > { %863 = vmatpush3.bf16.msra.mxu0 %v647_v12 }
  0x1a   : > { %847 = vmatmul.mubr.msk.bf16.gmra.mrb[4].mxu0 %vm387_vm0, %v883_v5 }
  0x1b   : > { %864 = vmatprep.mubr.msk.bf16.mxu0 %vm901_vm1, %v900_v7 }
  0xe5   : > { %v844_v14 = vpop.f32.mrb[0].mxu0 }
  0xe6   : > { %v474_v16 = vmul.f32 %v844_v14, %v796_v13  ;;  %v434_v17 = vpop.f32.mrb[1].mxu0  ;;  %v640_v14 = vld [vmem:[%s1047_s7] sm:$0x1] }
  0xe7   : > { %v472_v18 = vmul.f32 %v796_v13, %v434_v17  ;;  %v845_v19 = vpop.f32.mrb[2].mxu0 }
  0xe8   : > { %v489_v20 = vadd.f32 %v797_v15, %v474_v16  ;;  %v475_v21 = vmul.f32 %v845_v19, %v796_v13  ;;  %v437_v22 = vpop.f32.mrb[3].mxu0 }
  0xe9   : > { %v487_v23 = vadd.f32 %v797_v15, %v472_v18  ;;  %v473_v24 = vmul.f32 %v796_v13, %v437_v22 }
  0xea   : > { %v819_v25 = vpack.c.bf16 %v489_v20, %v489_v20  ;;  %v490_v26 = vadd.f32 %v797_v15, %v475_v21  ;;  %v540_v37 = vsel %vm536_vm4, %v489_v20, 0.0 }
  0xeb   : > { %v817_v27 = vpack.c.bf16 %v487_v23, %v487_v23  ;;  %v488_v28 = vadd.f32 %v797_v15, %v473_v24  ;;  %v537_v30 = vsel %vm536_vm4, %v487_v23, 0.0 }
  0xec   : > { %530 = vst.msk [vmem:[%s1000_s17 + $0x8] sm:$0xf] %vm527_vm3, %v819_v25  ;;  %v820_v29 = vpack.c.bf16 %v490_v26, %v490_v26  ;;  %v542_v44 = vsel %vm536_vm4, %v490_v26, 0.0 }
  0xed   : > { %528 = vst.msk [vmem:[%s1000_s17] sm:$0xf] %vm527_vm3, %v817_v27  ;;  %v818_v31 = vpack.c.bf16 %v488_v28, %v488_v28  ;;  %v538_v32 = vsel %vm536_vm4, %v488_v28, 0.0  ;;  %v848_v33 = vpop.f32.mrb[4].mxu0 }
  0xee   : > { %531 = vst.msk [vmem:[%s1000_s17 + $0xc] sm:$0xf] %vm527_vm3, %v820_v29  ;;  %v539_v34 = vadd.f32 %v538_v32, %v537_v30  ;;  %v478_v35 = vmul.f32 %v848_v33, %v796_v13  ;;  %v450_v36 = vpop.f32.mrb[5].mxu0 }
  0xef   : > { %529 = vst.msk [vmem:[%s1000_s17 + $0x4] sm:$0xf] %vm527_vm3, %v818_v31  ;;  %v476_v38 = vmul.f32 %v796_v13, %v450_v36  ;;  %v849_v39 = vpop.f32.mrb[6].mxu0 }
  0xf0   : > { %v541_v40 = vadd.f32 %v540_v37, %v539_v34  ;;  %v493_v41 = vadd.f32 %v797_v15, %v478_v35  ;;  %v479_v42 = vmul.f32 %v849_v39, %v796_v13  ;;  %v453_v43 = vpop.f32.mrb[7].mxu0 }
  0xf1   : > { %v491_v45 = vadd.f32 %v797_v15, %v476_v38  ;;  %v477_v46 = vmul.f32 %v796_v13, %v453_v43 }
  0xf2   : > { %v823_v47 = vpack.c.bf16 %v493_v41, %v493_v41  ;;  %v543_v48 = vadd.f32 %v542_v44, %v541_v40  ;;  %v494_v49 = vadd.f32 %v797_v15, %v479_v42  ;;  %v548_v58 = vsel %vm536_vm4, %v493_v41, 0.0 }
  0xf3   : > { %v821_v50 = vpack.c.bf16 %v491_v45, %v491_v45  ;;  %v544_v51 = vsel %vm536_vm4, %v491_v45, 0.0  ;;  %v492_v52 = vadd.f32 %v797_v15, %v477_v46 }
  0xf4   : > { %534 = vst.msk [vmem:[%s1000_s17 + $0x18] sm:$0xf] %vm527_vm3, %v823_v47  ;;  %v545_v53 = vadd.f32 %v544_v51, %v543_v48  ;;  %v824_v54 = vpack.c.bf16 %v494_v49, %v494_v49  ;;  %v550_v60 = vsel %vm536_vm4, %v494_v49, 0.0 }
  0xf5   : > { %532 = vst.msk [vmem:[%s1000_s17 + $0x10] sm:$0xf] %vm527_vm3, %v821_v50  ;;  %v822_v55 = vpack.c.bf16 %v492_v52, %v492_v52  ;;  %v546_v56 = vsel %vm536_vm4, %v492_v52, 0.0 }
  0xf6   : > { %535 = vst.msk [vmem:[%s1000_s17 + $0x1c] sm:$0xf] %vm527_vm3, %v824_v54  ;;  %v547_v57 = vadd.f32 %v546_v56, %v545_v53 }
  0xf7   : > { %533 = vst.msk [vmem:[%s1000_s17 + $0x14] sm:$0xf] %vm527_vm3, %v822_v55 }
  0xf8   : > { %v549_v59 = vadd.f32 %v548_v58, %v547_v57 }
  0xfa   : > { %v551_v61 = vadd.f32 %v550_v60, %v549_v59 }
  0xfc   : > { %v552_v62 = vrot.slane %v551_v61, 4 }
  0xfe   : > { %v553_v63 = vadd.f32 %v552_v62, %v551_v61 }
 0x100   : > { %v554_v0 = vrot.slane %v553_v63, 2 }
 0x102   : > { %v555_v1 = vadd.f32 %v554_v0, %v553_v63 }
 0x104   : > { %v556_v2 = vrot.slane %v555_v1, 1 }
 0x106   : > { %v557_v3 = vadd.f32 %v556_v2, %v555_v1 }
 0x108   : > { %v559_v4 = vmul.f32 0.015625, %v557_v3 }
 0x10a   : > { %v560_v5 = vpack.c.bf16 %v559_v4, %v559_v4 }
 0x10c   : > { %859 = vmatmul.mubr.msk.bf16.vlgmr.msra.gmra.mrb[0].mxu1 %vm536_vm4, %v560_v5 }
 0x1df   : > { %v631_v7 = vpop.f32.mrb[0].mxu1 }
 0x1e0   : > { %v632_v8 = vadd.f32 %v631_v7, %v569_v6  ;;  %v860_v9 = vpop.f32.mrb[1].mxu1 }
 0x1e1   : > { %v634_v10 = vpop.f32.mrb[2].mxu1 }
 0x1e2   : > { %v637_v11 = vmax.f32 %v632_v8, 0.0  ;;  %v861_v12 = vpop.f32.mrb[3].mxu1 }
 0x1e4   : > { %v638_v13 = vpack.c.bf16 %v637_v11, %v637_v11 }
 0x1e6   : > { %865 = vmatmul.mubr.msk.bf16.vlgmr.msra.gmra.mrb[8].mxu0 %vm641_vm5, %v638_v13 }
 0x2b9   : > { %v683_v15 = vpop.f32.mrb[8].mxu0 }
 0x2ba   : > { %v684_v16 = vadd.f32 %v683_v15, %v640_v14  ;;  %v866_v17 = vpop.f32.mrb[9].mxu0 }
 0x2bb   : > { %v686_v18 = vpop.f32.mrb[10].mxu0 }
 0x2bc   : > { %v812_v19 = vmul.f32 -1.442695, %v684_v16  ;;  %v867_v20 = vpop.f32.mrb[11].mxu0 }
 0x2be   : > { %888 = vpow2.f32 %v812_v19 }
 0x2c8   : > { %v889_v21 = vpop.eup %888 }
 0x2c9   : > { %v692_v22 = vadd.f32 1.0, %v889_v21 }
 0x2cb   : > { %890 = vrcp.f32 %v692_v22 }
 0x2d5   : > { %v891_v23 = vpop.eup %890 }
 0x2d6   : > { %696 = vst.msk [vmem:[%s341_s23] sm:$0x1] %vm695_vm6, %v891_v23 }
 0x2d7 PF: > { %s20_s30 = sadd.s32 1, %s898_s30  }
 0x2d8   : > { %p17_p4 = scmp.ge.s32.totalorder %s20_s30, 4  }
 0x2da   :  { %19 = sbr.rel (!%p17_p4) target bundleno = 1 (0x1), region = 94 }

// kernel: _lambda_.13
= control target key start
LH: loop header
LB: loop body
LE: loop exit
PB: predicated region body
PF: predicated region fallthrough
CT: control target
= control target key end

     0   :  { %s619_s15 = smov 0   ;;  %s665_s0 = inlined_call_operand.vmem [shape: bf16[128,64], index: 0, kind: input, shape index: {}]   ;;  %s666_s1 = inlined_call_operand.vmem [shape: bf16[64,128], index: 1, kind: input, shape index: {}]   ;;  %s667_s2 = inlined_call_operand.vmem [shape: f32[1,128], index: 2, kind: input, shape index: {}]   ;;  %s668_s3 = inlined_call_operand.vmem [shape: f32[1,128], index: 3, kind: input, shape index: {}]   ;;  %s669_s4 = inlined_call_operand.vmem [shape: bf16[128,128], index: 4, kind: output, shape index: {}]  }
   0x1 LB: > { %s474_s16 = sadd.s32 4294967295, %s592_s15   ;;  %p478_p0 = scmp.ge.s32.totalorder %s592_s15, 1  ;;  %s592_s15 = sphi %s619_s15, %s14_s15  }
   0x2   : > { %p163_p1 = scmp.lt.s32.totalorder %s592_s15, 3 }
   0x4   : > { %p164_p2 = pnand %p478_p0, %p163_p1 }
   0x5   : > { %v578_v0 = vld [vmem:[%s666_s1] sm:$0xff] (!%p164_p2)   ;;  %s479_s19 = sshll.u32 (!%p164_p2), %s474_s16, 3  ;;  %v579_v1 = vld [vmem:[%s666_s1 + $0x8] sm:$0xff] (!%p164_p2)   ;;  %v580_v2 = vld [vmem:[%s666_s1 + $0x10] sm:$0xff] (!%p164_p2)   ;;  %vm262_vm0 = vcmask (!%p164_p2), 523264  }
   0x6   : > { %167 = sbr.rel (%p164_p2) target bundleno = 246 (0xf6), region = 36  ;;  %p190_p3 = scmp.lt.s32.totalorder (!%p164_p2), %s479_s19, 15  ;;  %546 = vmatprep.subr.bf16.mxu0 (!%p164_p2), %v578_v0  ;;  %562 = vmatprep.subr.bf16.mxu1 (!%p164_p2), %v578_v0  ;;  %v581_v3 = vld [vmem:[%s666_s1 + $0x18] sm:$0xff] (!%p164_p2)   ;;  %v495_v8 = vld [vmem:[%s667_s2] ss:$0 sm:$0xff] (!%p164_p2) }
   0x7   : > { %547 = vmatpush3.bf16.msra.mxu0 (!%p164_p2), %v578_v0  ;;  %566 = vmatpush3.bf16.msra.mxu1 (!%p164_p2), %v578_v0  ;;  %v496_v10 = vld [vmem:[%s668_s3] ss:$0 sm:$0xff] (!%p164_p2) }
   0x8   : > { %548 = vmatprep.subr.bf16.mxu0 (!%p164_p2), %v579_v1  ;;  %563 = vmatprep.subr.bf16.mxu1 (!%p164_p2), %v579_v1 }
   0xb   : > { %549 = vmatpush3.bf16.msra.mxu0 (!%p164_p2), %v579_v1  ;;  %567 = vmatpush3.bf16.msra.mxu1 (!%p164_p2), %v579_v1 }
   0xc   : > { %550 = vmatprep.subr.bf16.mxu0 (!%p164_p2), %v580_v2  ;;  %564 = vmatprep.subr.bf16.mxu1 (!%p164_p2), %v580_v2 }
   0xd   : > { %s671_s19 = smov (!%p190_p3, %s479_s19), 15 }
   0xe   : > { %s480_s24 = sshll.u32 %s671_s19, 2 }
   0xf   : > { %s193_s29 = scalar_lea.vmem %s665_s0, %s480_s24  ;;  %551 = vmatpush3.bf16.msra.mxu0 %v580_v2  ;;  %568 = vmatpush3.bf16.msra.mxu1 %v580_v2  ;;  %s199_s10 = scalar_lea.vmem %s669_s4, %s480_s24 }
  0x10   : > { %v582_v4 = vld [vmem:[%s193_s29] sm:$0xff]   ;;  %v583_v5 = vld [vmem:[%s193_s29 + $0x10] sm:$0xff]   ;;  %552 = vmatprep.subr.bf16.mxu0 %v581_v3  ;;  %565 = vmatprep.subr.bf16.mxu1 %v581_v3  ;;  %v584_v6 = vld [vmem:[%s193_s29 + $0x8] sm:$0xff]  }
  0x11   : > { %554 = vmatprep.mubr.msk.bf16.mxu0 %vm262_vm0, %v582_v4  ;;  %558 = vmatprep.mubr.msk.bf16.mxu1 %vm262_vm0, %v583_v5  ;;  %v585_v7 = vld [vmem:[%s193_s29 + $0x18] sm:$0xff]  }
  0x13   : > { %553 = vmatpush3.bf16.msra.mxu0 %v581_v3  ;;  %569 = vmatpush3.bf16.msra.mxu1 %v581_v3 }
  0x16   : > { %555 = vmatmul.mubr.msk.bf16.vlgmr.msra.gmra.mrb[0].mxu0 %vm262_vm0, %v584_v6  ;;  %559 = vmatmul.mubr.msk.bf16.vlgmr.msra.gmra.mrb[0].mxu1 %vm262_vm0, %v585_v7 }
  0xe9   : > { %v556_v9 = vpop.f32.mrb[0].mxu0  ;;  %v560_v11 = vpop.f32.mrb[0].mxu1 }
  0xea   : > { %v349_v12 = vmul.f32 %v556_v9, %v495_v8  ;;  %v353_v13 = vmul.f32 %v560_v11, %v495_v8  ;;  %v309_v14 = vpop.f32.mrb[1].mxu0  ;;  %v325_v15 = vpop.f32.mrb[1].mxu1 }
  0xeb   : > { %v347_v16 = vmul.f32 %v495_v8, %v309_v14  ;;  %v351_v17 = vmul.f32 %v495_v8, %v325_v15  ;;  %v557_v18 = vpop.f32.mrb[2].mxu0  ;;  %v561_v19 = vpop.f32.mrb[2].mxu1 }
  0xec   : > { %v364_v20 = vadd.f32 %v496_v10, %v349_v12  ;;  %v368_v21 = vadd.f32 %v496_v10, %v353_v13  ;;  %v350_v22 = vmul.f32 %v557_v18, %v495_v8  ;;  %v354_v23 = vmul.f32 %v561_v19, %v495_v8  ;;  %v312_v24 = vpop.f32.mrb[3].mxu0  ;;  %v328_v25 = vpop.f32.mrb[3].mxu1 }
  0xed   : > { %v362_v26 = vadd.f32 %v496_v10, %v347_v16  ;;  %v366_v27 = vadd.f32 %v496_v10, %v351_v17  ;;  %v348_v28 = vmul.f32 %v495_v8, %v312_v24  ;;  %v352_v29 = vmul.f32 %v495_v8, %v328_v25 }
  0xee   : > { %v365_v30 = vadd.f32 %v496_v10, %v350_v22  ;;  %v369_v31 = vadd.f32 %v496_v10, %v354_v23  ;;  %v372_v34 = vmax.f32 %v364_v20, 0.0  ;;  %v376_v35 = vmax.f32 %v368_v21, 0.0 }
  0xef   : > { %v363_v32 = vadd.f32 %v496_v10, %v348_v28  ;;  %v367_v33 = vadd.f32 %v496_v10, %v352_v29  ;;  %v370_v38 = vmax.f32 %v362_v26, 0.0  ;;  %v374_v39 = vmax.f32 %v366_v27, 0.0 }
  0xf0   : > { %v373_v36 = vmax.f32 %v365_v30, 0.0  ;;  %v377_v37 = vmax.f32 %v369_v31, 0.0 }
  0xf1   : > { %v371_v40 = vmax.f32 %v363_v32, 0.0  ;;  %v375_v41 = vmax.f32 %v367_v33, 0.0 }
  0xf2   : > { %v523_v42 = vpack.c.bf16 %v373_v36, %v372_v34  ;;  %v533_v43 = vpack.c.bf16 %v377_v37, %v376_v35 }
  0xf3   : > { %v518_v44 = vpack.c.bf16 %v371_v40, %v370_v38  ;;  %v528_v45 = vpack.c.bf16 %v375_v41, %v374_v39 }
  0xf4   : > { %535 = vst [vmem:[%s199_s10 + $0x8] sm:$0xff] %v523_v42   ;;  %537 = vst [vmem:[%s199_s10 + $0x18] sm:$0xff] %v533_v43  }
  0xf5   : > { %519 = vst [vmem:[%s199_s10] sm:$0xff] %v518_v44   ;;  %536 = vst [vmem:[%s199_s10 + $0x10] sm:$0xff] %v528_v45  }
  0xf6 PF: > { %s14_s15 = sadd.s32 1, %s592_s15  }
  0xf7   : > { %p11_p4 = scmp.ge.s32.totalorder %s14_s15, 4  }
  0xf9   :  { %13 = sbr.rel (!%p11_p4) target bundleno = 1 (0x1), region = 66 }

// kernel: _lambda_.10
= control target key start
LH: loop header
LB: loop body
LE: loop exit
PB: predicated region body
PF: predicated region fallthrough
CT: control target
= control target key end

     0   :  { %s2208_s15 = smov 0   ;;  %s2701_s0 = inlined_call_operand.vmem [shape: bf16[2,10,10,32], index: 0, kind: input, shape index: {}]   ;;  %s2702_s1 = inlined_call_operand.vmem [shape: bf16[9,32,32], index: 1, kind: input, shape index: {}]   ;;  %s2703_s2 = inlined_call_operand.vmem [shape: f32[1,32], index: 2, kind: input, shape index: {}]   ;;  %s2704_s3 = inlined_call_operand.vmem [shape: f32[1,32], index: 3, kind: input, shape index: {}]   ;;  %s2705_s4 = inlined_call_operand.vmem [shape: bf16[2,64,32], index: 4, kind: output, shape index: {}]  }
   0x1 LB: > { %s1715_s16 = sadd.s32 4294967295, %s2181_s15   ;;  %p1719_p0 = scmp.ge.s32.totalorder %s2181_s15, 1  ;;  %s2181_s15 = sphi %s2208_s15, %s14_s15  }
   0x2   : > { %p162_p1 = scmp.lt.s32.totalorder %s2181_s15, 3 }
   0x4   : > { %p163_p2 = pnand %p1719_p0, %p162_p1 }
   0x5   : > { %v2145_v0 = vld [vmem:[%s2702_s1 + $0x10] sm:$0xff] (!%p163_p2)   ;;  %p188_p3 = scmp.lt.s32.totalorder (!%p163_p2), %s1715_s16, 1  ;;  %v2222_v1 = vld [vmem:[%s2702_s1 + $0x40] sm:$0xff] (!%p163_p2)   ;;  %v2147_v2 = vld [vmem:[%s2702_s1 + $0x18] sm:$0xff] (!%p163_p2)   ;;  %vm255_vm0 = vcmask (!%p163_p2), 1046528   ;;  %vm309_vm1 = vcmask (!%p163_p2), 261120  }
   0x6   : > { %166 = sbr.rel (%p163_p2) target bundleno = 328 (0x148), region = 36  ;;  %1960 = vmatprep.subr.bf16.mxu1 (!%p163_p2), %v2145_v0  ;;  %2008 = vmatprep.subr.bf16.mxu0 (!%p163_p2), %v2222_v1  ;;  %v2233_v3 = vld [vmem:[%s2702_s1 + $0x48] sm:$0xff] (!%p163_p2)   ;;  %v2240_v4 = vld [vmem:[%s2702_s1] sm:$0xff] (!%p163_p2)   ;;  %v2246_v5 = vld [vmem:[%s2702_s1 + $0x50] sm:$0xff] (!%p163_p2)   ;;  %vm500_vm2 = vcmask (!%p163_p2), 1045504   ;;  %vm1651_vm3 = vcmask (!%p163_p2), 257024  }
   0x7   : > { %1961 = vmatpush3.bf16.msra.mxu1 (!%p163_p2), %v2145_v0  ;;  %2009 = vmatpush3.bf16.msra.mxu0 (!%p163_p2), %v2222_v1 }
   0x8   : > { %1962 = vmatprep.subr.bf16.mxu1 (!%p163_p2), %v2147_v2  ;;  %2010 = vmatprep.subr.bf16.mxu0 (!%p163_p2), %v2233_v3 }
   0xb   : > { %1963 = vmatpush3.bf16.msra.mxu1 (!%p163_p2), %v2147_v2  ;;  %2011 = vmatpush3.bf16.msra.mxu0 (!%p163_p2), %v2233_v3 }
   0xc   : > { %1972 = vmatprep.subr.bf16.mxu1 (!%p163_p2), %v2240_v4  ;;  %2020 = vmatprep.subr.bf16.mxu0 (!%p163_p2), %v2246_v5 }
   0xd   : > { %s2707_s16 = smov (!%p188_p3, %s1715_s16), 1 }
   0xe   : > { %s2136_s25 = smul.u32 80, %s2707_s16  ;;  %s1897_s11 = sshll.u32 %s2707_s16, 5 }
   0xf   : > { %s2680_s14 = scalar_lea.vmem %s2705_s4, %s1897_s11 }
  0x10   : > { %s2251_s6 = scalar_lea.vmem %s2701_s0, %s2136_s25 }
  0x11   : > { %v2254_v6 = vld [vmem:[%s2251_s6] sm:$0xf]  ;;  %v2257_v7 = vld [vmem:[%s2251_s6 + $0x8] sm:$0xf]  ;;  %v2260_v8 = vld [vmem:[%s2251_s6 + $0x4] sm:$0x1] }
  0x12   : > { %v207_v9 = vunpack.c.l.bf16 %v2254_v6  ;;  %v208_v10 = vunpack.c.l.bf16 %v2257_v7  ;;  %v2266_v11 = vld [vmem:[%s2251_s6 + $0xc] sm:$0x1]  ;;  %v231_v12 = vunpack.c.l.bf16 %v2260_v8  ;;  %v1775_v13 = vld [vmem:[%s2251_s6 + $0x8] ss:$8 sps:$4 sm:$0xff]   ;;  %v1778_v16 = vld [vmem:[%s2251_s6 + $0x14] sm:$0x1]  ;;  %v1723_v58 = vcombine.low %v2254_v6, %v2257_v7 }
  0x13   : > { %v1776_v14 = vld [vmem:[%s2251_s6 + $0xc] sm:$0x1]  ;;  %v232_v15 = vunpack.c.l.bf16 %v2266_v11  ;;  %v778_v17 = vunpack.c.l.bf16 %v1775_v13  ;;  %v780_v19 = vunpack.c.h.bf16 %v1775_v13  ;;  %v2278_v23 = vld [vmem:[%s2251_s6 + $0x10] sm:$0xf]  ;;  %v781_v25 = vunpack.c.l.bf16 %v1778_v16  ;;  %v2283_v27 = vld [vmem:[%s2251_s6 + $0x18] sm:$0xf] }
  0x14   : > { %v779_v18 = vunpack.c.l.bf16 %v1776_v14  ;;  %v256_v20 = vrot.slane %v207_v9, 1  ;;  %v257_v21 = vrot.slane %v231_v12, 1  ;;  %v259_v22 = vrot.slane %v208_v10, 1  ;;  %v2287_v31 = vld [vmem:[%s2251_s6 + $0x14] sm:$0x1]  ;;  %v2153_v14 = vld [vmem:[%s2702_s1 + $0x8] sm:$0xff]  }
  0x15   : > { %v260_v24 = vrot.slane %v232_v15, 1  ;;  %v810_v26 = vrot.slane %v778_v17, 1  ;;  %v813_v30 = vrot.slane %v780_v19, 1  ;;  %v2290_v32 = vld [vmem:[%s2251_s6 + $0x1c] sm:$0x1]  ;;  %v814_v34 = vrot.slane %v781_v25, 1 }
  0x16   : > { %v258_v28 = vsel %vm255_vm0, %v256_v20, %v257_v21  ;;  %v811_v29 = vrot.slane %v779_v18, 1  ;;  %v2293_v35 = vrot.slane %v779_v18, 2  ;;  %v209_v36 = vunpack.c.l.bf16 %v2278_v23  ;;  %v1779_v37 = vld [vmem:[%s2251_s6 + $0x18] ss:$8 sps:$4 sm:$0xff]   ;;  %v1780_v38 = vld [vmem:[%s2251_s6 + $0x1c] sm:$0x1] }
  0x17   : > { %v261_v33 = vsel %vm255_vm0, %v259_v22, %v260_v24  ;;  %v2299_v41 = vrot.slane %v781_v25, 2  ;;  %v210_v42 = vunpack.c.l.bf16 %v2283_v27  ;;  %v1782_v43 = vld [vmem:[%s2251_s6 + $0x24] sm:$0x1]  ;;  %v815_v44 = vsel %vm255_vm0, %v813_v30, %v814_v34  ;;  %v2307_v48 = vld [vmem:[%s2251_s6 + $0x20] sm:$0xf]  ;;  %v2159_v11 = vld [vmem:[%s2702_s1 + $0x28] sm:$0xff]  }
  0x18   : > { %v288_v39 = vpack.c.bf16 %v261_v33, %v258_v28  ;;  %v812_v40 = vsel %vm255_vm0, %v810_v26, %v811_v29  ;;  %v233_v45 = vunpack.c.l.bf16 %v2287_v31  ;;  %v234_v46 = vunpack.c.l.bf16 %v2290_v32  ;;  %v2311_v53 = vld [vmem:[%s2251_s6 + $0x28] sm:$0xf]  ;;  %v2318_v56 = vld [vmem:[%s2251_s6 + $0x24] sm:$0x1]  ;;  %v2321_v57 = vld [vmem:[%s2251_s6 + $0x2c] sm:$0x1] }
  0x19   : > { %v262_v47 = vrot.slane %v209_v36, 1  ;;  %v842_v49 = vpack.c.bf16 %v815_v44, %v812_v40  ;;  %v265_v50 = vrot.slane %v210_v42, 1  ;;  %v782_v51 = vunpack.c.l.bf16 %v1779_v37  ;;  %v2327_v63 = vld [vmem:[%s2251_s6 + $0x30] sm:$0xf]  ;;  %v2330_v0 = vld [vmem:[%s2251_s6 + $0x38] sm:$0xf] }
  0x1a   : > { %1964 = vmatprep.mubr.msk.bf16.mxu1 %vm309_vm1, %v288_v39  ;;  %v783_v52 = vunpack.c.l.bf16 %v1780_v38  ;;  %v263_v54 = vrot.slane %v233_v45, 1  ;;  %v266_v55 = vrot.slane %v234_v46, 1  ;;  %v784_v59 = vunpack.c.h.bf16 %v1779_v37  ;;  %v2341_v16 = vld [vmem:[%s2251_s6 + $0x34] sm:$0x1]  ;;  %v2344_v17 = vld [vmem:[%s2251_s6 + $0x3c] sm:$0x1] }
  0x1b   : > { %2012 = vmatprep.mubr.msk.bf16.mxu0 %vm309_vm1, %v842_v49  ;;  %v785_v60 = vunpack.c.l.bf16 %v1782_v43  ;;  %v816_v61 = vrot.slane %v782_v51, 1  ;;  %v211_v13 = vunpack.c.l.bf16 %v2307_v48  ;;  %v212_v24 = vunpack.c.l.bf16 %v2311_v53  ;;  %v1801_v28 = vld [vmem:[%s2251_s6 + $0x8] sm:$0xe]  ;;  %v1802_v29 = vld [vmem:[%s2251_s6 + $0x10] sm:$0xe]  ;;  %v2152_v33 = vld [vmem:[%s2702_s1 + $0x58] sm:$0xff]  }
  0x1c   : > { %v817_v62 = vrot.slane %v783_v52, 1  ;;  %v264_v2 = vsel %vm255_vm0, %v262_v47, %v263_v54  ;;  %v267_v9 = vsel %vm255_vm0, %v265_v50, %v266_v55  ;;  %v2334_v10 = vrot.slane %v783_v52, 2  ;;  %v1803_v43 = vld [vmem:[%s2251_s6 + $0x18] sm:$0xe]  ;;  %v2370_v44 = vld [vmem:[%s2702_s1 + $0x20] sm:$0xff]   ;;  %v2480_v32 = vld [vmem:[%s2702_s1 + $0x30] sm:$0xff]  }
  0x1d   : > { %v289_v18 = vpack.c.bf16 %v267_v9, %v264_v2  ;;  %v819_v20 = vrot.slane %v784_v59, 1  ;;  %v820_v21 = vrot.slane %v785_v60, 1  ;;  %v2347_v22 = vrot.slane %v785_v60, 2  ;;  %v1804_v51 = vld [vmem:[%s2251_s6 + $0x20] sm:$0xe] }
  0x1e   : > { %v818_v19 = vsel %vm255_vm0, %v816_v61, %v817_v62  ;;  %v235_v25 = vunpack.c.l.bf16 %v2318_v56  ;;  %v236_v26 = vunpack.c.l.bf16 %v2321_v57  ;;  %v268_v34 = vrot.slane %v211_v13, 1  ;;  %v2376_v52 = vld [vmem:[%s2251_s6 + $0x2c] sm:$0x1]  ;;  %v2384_v61 = vld [vmem:[%s2702_s1 + $0x60] sm:$0xff]   ;;  %v2387_v62 = vld [vmem:[%s2251_s6 + $0x34] sm:$0x1] }
  0x1f   : > { %1965 = vmatmul.mubr.msk.bf16.vlgmr.msra.gmra.mrb[0].mxu1 %vm309_vm1, %v289_v18  ;;  %v821_v30 = vsel %vm255_vm0, %v819_v20, %v820_v21  ;;  %v213_v36 = vunpack.c.l.bf16 %v2327_v63  ;;  %v214_v37 = vunpack.c.l.bf16 %v2330_v0  ;;  %v271_v40 = vrot.slane %v212_v24, 1  ;;  %v1806_v20 = vld [vmem:[%s2251_s6 + $0x30] sm:$0xe] }
  0x20   : > { %1973 = vmatpush3.bf16.msra.mxu1 %v2240_v4  ;;  %v843_v38 = vpack.c.bf16 %v821_v30, %v818_v19  ;;  %v269_v39 = vrot.slane %v235_v25, 1  ;;  %v272_v42 = vrot.slane %v236_v26, 1  ;;  %v237_v47 = vunpack.c.l.bf16 %v2341_v16  ;;  %v1805_v19 = vld [vmem:[%s2251_s6 + $0x28] sm:$0xe]  ;;  %v2398_v30 = vld [vmem:[%s2251_s6 + $0x3c] sm:$0x1] }
  0x21   : > { %1974 = vmatprep.subr.bf16.mxu1 %v2153_v14  ;;  %v238_v4 = vunpack.c.l.bf16 %v2344_v17  ;;  %v274_v49 = vrot.slane %v213_v36, 1  ;;  %v277_v50 = vrot.slane %v214_v37, 1  ;;  %v956_v59 = vunpack.c.l.bf16 %v1801_v28  ;;  %v2166_v16 = vld [vmem:[%s2702_s1 + $0x78] sm:$0xff]  }
  0x22   : > { %2013 = vmatmul.mubr.msk.bf16.vlgmr.msra.gmra.mrb[0].mxu0 %vm309_vm1, %v843_v38  ;;  %v270_v54 = vsel %vm255_vm0, %v268_v34, %v269_v39  ;;  %v273_v55 = vsel %vm255_vm0, %v271_v40, %v272_v42  ;;  %v957_v60 = vunpack.c.l.bf16 %v1802_v29  ;;  %v275_v9 = vrot.slane %v237_v47, 1  ;;  %v1807_v38 = vld [vmem:[%s2251_s6 + $0x38] sm:$0xe] }
  0x23   : > { %2021 = vmatpush3.bf16.msra.mxu0 %v2246_v5  ;;  %v290_v2 = vpack.c.bf16 %v273_v55, %v270_v54  ;;  %v278_v13 = vrot.slane %v238_v4, 1  ;;  %v958_v18 = vunpack.c.l.bf16 %v1803_v43  ;;  %v972_v21 = vrot.slane %v956_v59, 2  ;;  %v2401_v5 = vld [vmem:[%s2251_s6 + $0x44] sm:$0x1]  ;;  %v1808_v55 = vld [vmem:[%s2251_s6 + $0x40] sm:$0xe] }
  0x24   : > { %2022 = vmatprep.subr.bf16.mxu0 %v2152_v33  ;;  %1975 = vmatpush3.bf16.msra.mxu1 %v2153_v14  ;;  %v975_v24 = vrot.slane %v957_v60, 2  ;;  %v959_v28 = vunpack.c.l.bf16 %v1804_v51  ;;  %v787_v29 = vunpack.c.l.bf16 %v2376_v52  ;;  %v276_v34 = vsel %vm255_vm0, %v274_v49, %v275_v9  ;;  %v476_v9 = vld [vmem:[%s2251_s6] sm:$0xe] }
  0x25   : > { %1968 = vmatprep.mubr.msk.bf16.mxu1 %vm309_vm1, %v290_v2  ;;  %v279_v36 = vsel %vm255_vm0, %v277_v50, %v278_v13  ;;  %v978_v37 = vrot.slane %v958_v18, 2  ;;  %1984 = vmatprep.subr.bf16.mxu1 %v2370_v44  ;;  %v789_v14 = vunpack.c.l.bf16 %v2387_v62  ;;  %v974_v40 = vsel %vm500_vm2, %v972_v21, %v2293_v35  ;;  %v478_v21 = vld [vmem:[%s2251_s6 + $0x10] sm:$0xe] }
  0x26   : > { %v291_v39 = vpack.c.bf16 %v279_v36, %v276_v34  ;;  %v977_v42 = vsel %vm500_vm2, %v975_v24, %v2299_v41  ;;  %v981_v43 = vrot.slane %v959_v28, 2  ;;  %v960_v50 = vunpack.c.l.bf16 %v1805_v19  ;;  %v2157_v34 = vld [vmem:[%s2702_s1 + $0x68] sm:$0xff]  }
  0x27   : > { %2023 = vmatpush3.bf16.msra.mxu0 %v2152_v33  ;;  %v1004_v51 = vpack.c.bf16 %v977_v42, %v974_v40  ;;  %v980_v49 = vsel %vm500_vm2, %v978_v37, %v2334_v10  ;;  %v961_v54 = vunpack.c.l.bf16 %v1806_v20  ;;  %v985_v41 = vrot.slane %v787_v29, 2  ;;  %v479_v40 = vld [vmem:[%s2251_s6 + $0x18] sm:$0xe] }
  0x28   : > { %1969 = vmatmul.mubr.msk.bf16.gmra.mrb[4].mxu1 %vm309_vm1, %v291_v39  ;;  %2032 = vmatprep.subr.bf16.mxu0 %v2384_v61  ;;  %v983_v35 = vsel %vm500_vm2, %v981_v43, %v2347_v22  ;;  %v988_v33 = vrot.slane %v789_v14, 2  ;;  %v791_v10 = vunpack.c.l.bf16 %v2398_v30  ;;  %v502_v59 = vrot.slane %v231_v12, 2  ;;  %v477_v12 = vld [vmem:[%s2251_s6 + $0x8] sm:$0xe] }
  0x29   : > { %2024 = vmatprep.mubr.msk.bf16.mxu0 %vm309_vm1, %v1004_v51  ;;  %1976 = vmatprep.mubr.msk.bf16.mxu1 %vm309_vm1, %v1723_v58  ;;  %v984_v22 = vrot.slane %v960_v50, 2  ;;  %v987_v60 = vrot.slane %v961_v54, 2  ;;  %v793_v2 = vunpack.c.l.bf16 %v2401_v5  ;;  %v1005_v13 = vpack.c.bf16 %v983_v35, %v980_v49  ;;  %v480_v49 = vld [vmem:[%s2251_s6 + $0x20] sm:$0xe]  ;;  %v481_v50 = vld [vmem:[%s2251_s6 + $0x28] sm:$0xe] }
  0x2a   : > { %v962_v18 = vunpack.c.l.bf16 %v1807_v38  ;;  %v963_v19 = vunpack.c.l.bf16 %v1808_v55  ;;  %v991_v8 = vrot.slane %v791_v10, 2  ;;  %v505_v20 = vrot.slane %v232_v15, 2  ;;  %v2161_v55 = vld [vmem:[%s2251_s6 + $0x10] ss:$8 sps:$4 sm:$0xff]  }
  0x2b   : > { %v986_v6 = vsel %vm500_vm2, %v984_v22, %v985_v41  ;;  %v989_v7 = vsel %vm500_vm2, %v987_v60, %v988_v33  ;;  %v994_v58 = vrot.slane %v793_v2, 2  ;;  %v1724_v24 = vcombine.low %v2278_v23, %v2283_v27  ;;  %v482_v33 = vld [vmem:[%s2251_s6 + $0x30] sm:$0xe]  ;;  %v483_v22 = vld [vmem:[%s2251_s6 + $0x38] sm:$0xe] }
  0x2c   : > { %v1006_v28 = vpack.c.bf16 %v989_v7, %v986_v6  ;;  %v990_v36 = vrot.slane %v962_v18, 2  ;;  %v993_v37 = vrot.slane %v963_v19, 2  ;;  %v1725_v15 = vcombine.low %v2307_v48, %v2311_v53  ;;  %v2466_v53 = vld [vmem:[%s2702_s1 + $0x70] sm:$0xff]  }
  0x2d   : > { %v484_v38 = vunpack.c.l.bf16 %v476_v9  ;;  %v485_v39 = vunpack.c.l.bf16 %v477_v12  ;;  %v486_v23 = vunpack.c.l.bf16 %v478_v21  ;;  %v508_v48 = vrot.slane %v233_v45, 2  ;;  %v1841_v60 = vld [vmem:[%s2251_s6 + $0x10] ss:$8 sps:$4 sm:$0xff]  }
  0x2e   : > { %2025 = vmatmul.mubr.msk.bf16.vlgmr.msra.gmra.mrb[0].mxu0 %vm309_vm1, %v1005_v13  ;;  %v992_v27 = vsel %vm500_vm2, %v990_v36, %v991_v8  ;;  %v995_v42 = vsel %vm500_vm2, %v993_v37, %v994_v58  ;;  %v487_v45 = vunpack.c.l.bf16 %v479_v40  ;;  %v1726_v9 = vcombine.low %v2327_v63, %v2330_v0  ;;  %v2489_v13 = vld [vmem:[%s2251_s6 + $0x14] sm:$0x1]  ;;  %v2514_v36 = vld [vmem:[%s2251_s6 + $0x24] sm:$0x1]  ;;  %v2165_v37 = vld [vmem:[%s2251_s6 + $0x30] ss:$8 sps:$4 sm:$0xff]  }
  0x2f   : > { %2033 = vmatpush3.bf16.msra.mxu0 %v2384_v61  ;;  %2028 = vmatprep.mubr.msk.bf16.mxu0 %vm309_vm1, %v1006_v28  ;;  %v501_v43 = vrot.slane %v484_v38, 2  ;;  %v504_v51 = vrot.slane %v485_v39, 2  ;;  %v511_v61 = vrot.slane %v234_v46, 2  ;;  %v1007_v31 = vpack.c.bf16 %v995_v42, %v992_v27 }
  0x30   : > { %1977 = vmatmul.mubr.msk.bf16.vlgmr.msra.gmra.mrb[0].mxu1 %vm309_vm1, %v1724_v24  ;;  %2034 = vmatprep.subr.bf16.mxu0 %v2157_v34  ;;  %v507_v54 = vrot.slane %v486_v23, 2  ;;  %v488_v46 = vunpack.c.l.bf16 %v480_v49  ;;  %v510_v19 = vrot.slane %v487_v45, 2  ;;  %v514_v8 = vrot.slane %v235_v25, 2  ;;  %v2168_v45 = vld [vmem:[%s2702_s1 + $0x38] sm:$0xff]  }
  0x31   : > { %1985 = vmatpush3.bf16.msra.mxu1 %v2370_v44  ;;  %1980 = vmatprep.mubr.msk.bf16.mxu1 %vm309_vm1, %v1725_v15  ;;  %v503_v35 = vsel %vm500_vm2, %v501_v43, %v502_v59  ;;  %v506_v41 = vsel %vm500_vm2, %v504_v51, %v505_v20  ;;  %v489_v44 = vunpack.c.l.bf16 %v481_v50  ;;  %v2492_v59 = vld [vmem:[%s2251_s6 + $0x1c] sm:$0x1]  ;;  %v517_v12 = vrot.slane %v236_v26, 2  ;;  %v2163_v26 = vld [vmem:[%s2251_s6 + $0x20] ss:$8 sps:$4 sm:$0xff]  }
  0x32   : > { %1986 = vmatprep.subr.bf16.mxu1 %v2159_v11  ;;  %v533_v18 = vpack.c.bf16 %v506_v41, %v503_v35  ;;  %v513_v63 = vrot.slane %v488_v46, 2  ;;  %v490_v20 = vunpack.c.l.bf16 %v482_v33  ;;  %v491_v6 = vunpack.c.l.bf16 %v483_v22  ;;  %v2523_v15 = vld [vmem:[%s2251_s6 + $0x2c] sm:$0x1]  ;;  %v1849_v51 = vld [vmem:[%s2251_s6 + $0x30] ss:$8 sps:$4 sm:$0xff]   ;;  %v2553_v33 = vld [vmem:[%s2702_s1 + $0x80] sm:$0xff]  }
  0x33   : > { %2035 = vmatpush3.bf16.msra.mxu0 %v2157_v34  ;;  %v516_v0 = vrot.slane %v489_v44, 2  ;;  %v1249_v7 = vunpack.c.l.bf16 %v1841_v60  ;;  %v1250_v56 = vunpack.c.l.bf16 %v2489_v13  ;;  %v1251_v25 = vunpack.c.h.bf16 %v1841_v60  ;;  %v1845_v34 = vld [vmem:[%s2251_s6 + $0x20] ss:$8 sps:$4 sm:$0xff]  }
  0x34   : > { %2044 = vmatprep.subr.bf16.mxu0 %v2466_v53  ;;  %v1252_v57 = vunpack.c.l.bf16 %v2492_v59  ;;  %v520_v58 = vrot.slane %v237_v47, 2  ;;  %v523_v21 = vrot.slane %v238_v4, 2  ;;  %v509_v24 = vsel %vm500_vm2, %v507_v54, %v508_v48  ;;  %v2532_v48 = vld [vmem:[%s2251_s6 + $0x34] sm:$0x1] }
  0x35   : > { %1987 = vmatpush3.bf16.msra.mxu1 %v2159_v11  ;;  %v512_v28 = vsel %vm500_vm2, %v510_v19, %v511_v61  ;;  %v515_v47 = vsel %vm500_vm2, %v513_v63, %v514_v8  ;;  %v518_v17 = vsel %vm500_vm2, %v516_v0, %v517_v12  ;;  %v519_v4 = vrot.slane %v490_v20, 2  ;;  %v2167_v12 = vld [vmem:[%s2251_s6 + $0x40] ss:$8 sps:$4 sm:$0xff]  }
  0x36   : > { %2029 = vmatmul.mubr.msk.bf16.gmra.mrb[4].mxu0 %vm309_vm1, %v1007_v31  ;;  %1996 = vmatprep.subr.bf16.mxu1 %v2480_v32  ;;  %v522_v11 = vrot.slane %v491_v6, 2  ;;  %v1281_v38 = vrot.slane %v1249_v7, 1  ;;  %v1282_v39 = vrot.slane %v1250_v56, 1  ;;  %v1284_v40 = vrot.slane %v1251_v25, 1  ;;  %v2536_v31 = vld [vmem:[%s2251_s6 + $0x3c] sm:$0x1] }
  0x37   : > { %2036 = vmatprep.mubr.msk.bf16.mxu0 %vm309_vm1, %v2161_v55  ;;  %v1285_v23 = vrot.slane %v1252_v57, 1  ;;  %v534_v27 = vpack.c.bf16 %v512_v28, %v509_v24  ;;  %v1253_v42 = vunpack.c.l.bf16 %v1845_v34  ;;  %v1254_v43 = vunpack.c.l.bf16 %v2514_v36  ;;  %v1853_v63 = vld [vmem:[%s2251_s6 + $0x40] ss:$8 sps:$4 sm:$0xff]   ;;  %v2572_v6 = vld [vmem:[%s2251_s6 + $0x44] sm:$0x1] }
  0x38   : > { %1981 = vmatmul.mubr.msk.bf16.gmra.mrb[4].mxu1 %vm309_vm1, %v1726_v9  ;;  %v535_v49 = vpack.c.bf16 %v518_v17, %v515_v47  ;;  %v1255_v50 = vunpack.c.h.bf16 %v1845_v34  ;;  %v1256_v61 = vunpack.c.l.bf16 %v2523_v15  ;;  %v521_v54 = vsel %vm500_vm2, %v519_v4, %v520_v58  ;;  %v1783_v0 = vld [vmem:[%s2251_s6 + $0x28] ss:$8 sps:$4 sm:$0xff]  }
  0x39   : > { %1988 = vmatprep.mubr.msk.bf16.mxu1 %vm309_vm1, %v533_v18  ;;  %v524_v55 = vsel %vm500_vm2, %v522_v11, %v523_v21  ;;  %v1283_v35 = vsel %vm255_vm0, %v1281_v38, %v1282_v39  ;;  %v1286_v41 = vsel %vm255_vm0, %v1284_v40, %v1285_v23  ;;  %v1257_v46 = vunpack.c.l.bf16 %v1849_v51  ;;  %v2170_v25 = vld [vmem:[%s2251_s6 + $0x8] ss:$8 sps:$4 sm:$0xff]   ;;  %v2580_v21 = vld [vmem:[%s2251_s6 + $0x4c] sm:$0x1]  ;;  %v1787_v40 = vld [vmem:[%s2251_s6 + $0x38] ss:$8 sps:$4 sm:$0xff]  }
  0x3a   : > { %v1258_v44 = vunpack.c.l.bf16 %v2532_v48  ;;  %v1288_v22 = vrot.slane %v1254_v43, 1  ;;  %v1259_v60 = vunpack.c.h.bf16 %v1849_v51  ;;  %v1260_v9 = vunpack.c.l.bf16 %v2536_v31 }
  0x3b   : > { %v2560_v18 = vrot.slane %v791_v10, 1  ;;  %v1290_v19 = vrot.slane %v1255_v50, 1  ;;  %v1291_v8 = vrot.slane %v1256_v61, 1  ;;  %v536_v20 = vpack.c.bf16 %v524_v55, %v521_v54 }
  0x3c   : > { %v1313_v30 = vpack.c.bf16 %v1286_v41, %v1283_v35  ;;  %v1293_v10 = vrot.slane %v1257_v46, 1  ;;  %v1297_v58 = vrot.slane %v1260_v9, 1  ;;  %v786_v24 = vunpack.c.l.bf16 %v1783_v0 }
  0x3d   : > { %v1292_v28 = vsel %vm255_vm0, %v1290_v19, %v1291_v8  ;;  %v1261_v34 = vunpack.c.l.bf16 %v1853_v63  ;;  %v788_v47 = vunpack.c.h.bf16 %v1783_v0  ;;  %v823_v17 = vrot.slane %v787_v29, 1  ;;  %v1869_v19 = vld [vmem:[%s2251_s6 + $0x20] sm:$0xe] }
  0x3e   : > { %2037 = vmatmul.mubr.msk.bf16.vlgmr.msra.gmra.mrb[0].mxu0 %vm309_vm1, %v2163_v26  ;;  %v1296_v26 = vrot.slane %v1259_v60, 1  ;;  %v1262_v4 = vunpack.c.l.bf16 %v2572_v6  ;;  %v1263_v11 = vunpack.c.h.bf16 %v1853_v63  ;;  %v822_v38 = vrot.slane %v786_v24, 1 }
  0x3f   : > { %2045 = vmatpush3.bf16.msra.mxu0 %v2466_v53  ;;  %2040 = vmatprep.mubr.msk.bf16.mxu0 %vm309_vm1, %v2165_v37  ;;  %v1287_v53 = vrot.slane %v1253_v42, 1  ;;  %v1867_v37 = vld [vmem:[%s2251_s6 + $0x10] sm:$0xe]  ;;  %v826_v39 = vrot.slane %v789_v14, 1  ;;  %v832_v23 = vrot.slane %v793_v2, 1  ;;  %v1264_v29 = vunpack.c.l.bf16 %v2580_v21 }
  0x40   : > { %1989 = vmatmul.mubr.msk.bf16.vlgmr.msra.gmra.mrb[0].mxu1 %vm309_vm1, %v534_v27  ;;  %2046 = vmatprep.subr.bf16.mxu0 %v2166_v16  ;;  %v825_v27 = vrot.slane %v788_v47, 1  ;;  %v1298_v42 = vsel %vm255_vm0, %v1296_v26, %v1297_v58  ;;  %v1427_v51 = vunpack.c.l.bf16 %v1867_v37  ;;  %v2601_v62 = vsel %vm255_vm0, %v822_v38, %v823_v17  ;;  %v2174_v37 = vld [vmem:[%s2251_s6 + $0x38] ss:$8 sps:$4 sm:$0xff]  }
  0x41   : > { %1997 = vmatpush3.bf16.msra.mxu1 %v2480_v32  ;;  %1992 = vmatprep.mubr.msk.bf16.mxu1 %vm309_vm1, %v535_v49  ;;  %v1294_v32 = vrot.slane %v1258_v44, 1  ;;  %v1289_v7 = vsel %vm255_vm0, %v1287_v53, %v1288_v22  ;;  %v1299_v14 = vrot.slane %v1261_v34, 1  ;;  %v790_v50 = vunpack.c.l.bf16 %v1787_v40  ;;  %v2172_v53 = vld [vmem:[%s2702_s1 + $0x88] sm:$0xff]  }
  0x42   : > { %1998 = vmatprep.subr.bf16.mxu1 %v2168_v45  ;;  %v1314_v5 = vpack.c.bf16 %v1292_v28, %v1289_v7  ;;  %v2605_v2 = vsel %vm255_vm0, %v825_v27, %v826_v39  ;;  %v1300_v54 = vrot.slane %v1262_v4, 1  ;;  %v1302_v55 = vrot.slane %v1263_v11, 1  ;;  %v1872_v7 = vld [vmem:[%s2251_s6 + $0x38] sm:$0xe]  ;;  %v1873_v39 = vld [vmem:[%s2251_s6 + $0x40] sm:$0xe] }
  0x43   : > { %2047 = vmatpush3.bf16.msra.mxu0 %v2166_v16  ;;  %v1868_v16 = vld [vmem:[%s2251_s6 + $0x18] sm:$0xe]  ;;  %v1295_v52 = vsel %vm255_vm0, %v1293_v10, %v1294_v32  ;;  %v844_v35 = vpack.c.bf16 %v2605_v2, %v2601_v62  ;;  %v792_v41 = vunpack.c.h.bf16 %v1787_v40  ;;  %v1303_v22 = vrot.slane %v1264_v29, 1  ;;  %v2173_v10 = vld [vmem:[%s2251_s6 + $0x28] ss:$8 sps:$4 sm:$0xff]  }
  0x44   : > { %2056 = vmatprep.subr.bf16.mxu0 %v2553_v33  ;;  %v1428_v49 = vunpack.c.l.bf16 %v1868_v16  ;;  %v1315_v46 = vpack.c.bf16 %v1298_v42, %v1295_v52  ;;  %v1444_v60 = vrot.slane %v1250_v56, 2  ;;  %v828_v8 = vrot.slane %v790_v50, 1  ;;  %v1871_v32 = vld [vmem:[%s2251_s6 + $0x30] sm:$0xe]  ;;  %v1874_v27 = vld [vmem:[%s2251_s6 + $0x48] sm:$0xe] }
  0x45   : > { %1999 = vmatpush3.bf16.msra.mxu1 %v2168_v45  ;;  %v2171_v45 = vld [vmem:[%s2251_s6 + $0x18] ss:$8 sps:$4 sm:$0xff]   ;;  %v1447_v0 = vrot.slane %v1252_v57, 2  ;;  %v1301_v13 = vsel %vm255_vm0, %v1299_v14, %v1300_v54  ;;  %v1304_v59 = vsel %vm255_vm0, %v1302_v55, %v1303_v22  ;;  %v1429_v57 = vunpack.c.l.bf16 %v1869_v19 }
  0x46   : > { %2041 = vmatmul.mubr.msk.bf16.gmra.mrb[4].mxu0 %vm309_vm1, %v2167_v12  ;;  %2068 = vmatprep.subr.bf16.mxu1 %v2222_v1  ;;  %v1443_v12 = vrot.slane %v1427_v51, 2  ;;  %v1446_v63 = vrot.slane %v1428_v49, 2  ;;  %v1431_v28 = vunpack.c.l.bf16 %v1871_v32  ;;  %v1432_v34 = vunpack.c.l.bf16 %v1872_v7  ;;  %v1886_v55 = vld [vmem:[%s2704_s3] ss:$0 sm:$0xff] }
  0x47   : > { %2048 = vmatprep.mubr.msk.bf16.mxu0 %vm309_vm1, %v1313_v30  ;;  %v831_v30 = vrot.slane %v792_v41, 1  ;;  %v1450_v16 = vrot.slane %v1254_v43, 2  ;;  %v1449_v17 = vrot.slane %v1429_v57, 2  ;;  %v1453_v38 = vrot.slane %v1256_v61, 2 }
  0x48   : > { %1993 = vmatmul.mubr.msk.bf16.gmra.mrb[4].mxu1 %vm309_vm1, %v536_v20  ;;  %v1870_v20 = vld [vmem:[%s2251_s6 + $0x28] sm:$0xe]  ;;  %v1448_v24 = vsel %vm500_vm2, %v1446_v63, %v1447_v0  ;;  %v1455_v40 = vrot.slane %v1431_v28, 2  ;;  %v1459_v52 = vrot.slane %v1260_v9, 2  ;;  %v1433_v43 = vunpack.c.l.bf16 %v1873_v39 }
  0x49   : > { %2000 = vmatprep.mubr.msk.bf16.mxu1 %vm309_vm1, %v2170_v25  ;;  %v830_v25 = vsel %vm255_vm0, %v828_v8, %v2560_v18  ;;  %v833_v56 = vsel %vm255_vm0, %v831_v30, %v832_v23  ;;  %v1430_v26 = vunpack.c.l.bf16 %v1870_v20  ;;  %v1445_v18 = vsel %vm500_vm2, %v1443_v12, %v1444_v60 }
  0x4a   : > { %v845_v58 = vpack.c.bf16 %v833_v56, %v830_v25  ;;  %v1475_v47 = vpack.c.bf16 %v1448_v24, %v1445_v18  ;;  %v1458_v23 = vrot.slane %v1432_v34, 2  ;;  %v1451_v36 = vsel %vm500_vm2, %v1449_v17, %v1450_v16 }
  0x4b   : > { %v1452_v11 = vrot.slane %v1430_v26, 2  ;;  %v1434_v61 = vunpack.c.l.bf16 %v1874_v27  ;;  %v1461_v42 = vrot.slane %v1433_v43, 2  ;;  %v1465_v49 = vrot.slane %v1264_v29, 2  ;;  %v1885_v29 = vld [vmem:[%s2703_s2] ss:$0 sm:$0xff] }
  0x4c   : > { %v1460_v31 = vsel %vm500_vm2, %v1458_v23, %v1459_v52 }
  0x4d   : > { %v1454_v15 = vsel %vm500_vm2, %v1452_v11, %v1453_v38  ;;  %v1464_v51 = vrot.slane %v1434_v61, 2 }
  0x4e   : > { %2049 = vmatmul.mubr.msk.bf16.vlgmr.msra.gmra.mrb[0].mxu0 %vm309_vm1, %v1314_v5 }
  0x4f   : > { %2057 = vmatpush3.bf16.msra.mxu0 %v2553_v33  ;;  %2052 = vmatprep.mubr.msk.bf16.mxu0 %vm309_vm1, %v1315_v46  ;;  %v1316_v33 = vpack.c.bf16 %v1304_v59, %v1301_v13  ;;  %v1466_v5 = vsel %vm500_vm2, %v1464_v51, %v1465_v49 }
  0x50   : > { %2001 = vmatmul.mubr.msk.bf16.vlgmr.msra.gmra.mrb[0].mxu1 %vm309_vm1, %v2171_v45  ;;  %2058 = vmatprep.subr.bf16.mxu0 %v2172_v53 }
  0x51   : > { %2070 = vmatpush3.bf16.msra.mxu1 %v2222_v1  ;;  %2004 = vmatprep.mubr.msk.bf16.mxu1 %vm309_vm1, %v2173_v10  ;;  %v1456_v1 = vrot.slane %v1258_v44, 2  ;;  %v1476_v44 = vpack.c.bf16 %v1454_v15, %v1451_v36 }
  0x52   : > { %2069 = vmatprep.subr.bf16.mxu1 %v2233_v3 }
  0x53   : > { %2059 = vmatpush3.bf16.msra.mxu0 %v2172_v53  ;;  %v1457_v48 = vsel %vm500_vm2, %v1455_v40, %v1456_v1 }
  0x54   : > { %v1477_v9 = vpack.c.bf16 %v1460_v31, %v1457_v48 }
  0x55   : > { %2071 = vmatpush3.bf16.msra.mxu1 %v2233_v3  ;;  %v1462_v3 = vrot.slane %v1262_v4, 2 }
  0x56   : > { %2053 = vmatmul.mubr.msk.bf16.gmra.mrb[4].mxu0 %vm309_vm1, %v1316_v33 }
  0x57   : > { %2060 = vmatprep.mubr.msk.bf16.mxu0 %vm309_vm1, %v1475_v47  ;;  %v1463_v62 = vsel %vm500_vm2, %v1461_v42, %v1462_v3 }
  0x58   : > { %2005 = vmatmul.mubr.msk.bf16.gmra.mrb[4].mxu1 %vm309_vm1, %v2174_v37  ;;  %v1478_v14 = vpack.c.bf16 %v1466_v5, %v1463_v62 }
  0x59   : > { %2016 = vmatprep.mubr.msk.bf16.mxu1 %vm309_vm1, %v844_v35 }
  0x5e   : > { %2061 = vmatmul.mubr.msk.bf16.vlgmr.msra.gmra.mrb[0].mxu0 %vm309_vm1, %v1476_v44 }
  0x5f   : > { %2064 = vmatprep.mubr.msk.bf16.mxu0 %vm309_vm1, %v1477_v9 }
  0x64   : > { %2017 = vmatmul.mubr.msk.bf16.vlgmr.msra.gmra.mrb[4].mxu1 %vm309_vm1, %v845_v58 }
  0x66   : > { %2065 = vmatmul.mubr.msk.bf16.gmra.mrb[4].mxu0 %vm309_vm1, %v1478_v14 }
 0x123   : > { %v2002_v6 = vpop.f32.mrb[0].mxu1 }
 0x124   : > { %v723_v4 = vpop.f32.mrb[1].mxu1 }
 0x125   : > { %v2003_v2 = vpop.f32.mrb[2].mxu1 }
 0x126   : > { %v726_v50 = vpop.f32.mrb[3].mxu1 }
 0x131   : > { %v2062_v21 = vpop.f32.mrb[0].mxu0 }
 0x132   : > { %v2072_v45 = vadd.f32 %v2062_v21, %v2002_v6  ;;  %v1542_v54 = vpop.f32.mrb[1].mxu0 }
 0x133   : > { %v2073_v35 = vadd.f32 %v1542_v54, %v723_v4  ;;  %v2063_v41 = vpop.f32.mrb[2].mxu0 }
 0x134   : > { %v1590_v46 = vmul.f32 %v2072_v45, %v1885_v29  ;;  %v2074_v53 = vadd.f32 %v2063_v41, %v2003_v2  ;;  %v1545_v22 = vpop.f32.mrb[3].mxu0 }
 0x135   : > { %v1588_v60 = vmul.f32 %v2073_v35, %v1885_v29  ;;  %v2075_v19 = vadd.f32 %v1545_v22, %v726_v50 }
 0x136   : > { %v1605_v8 = vadd.f32 %v1886_v55, %v1590_v46  ;;  %v1591_v12 = vmul.f32 %v2074_v53, %v1885_v29 }
 0x137   : > { %v1603_v63 = vadd.f32 %v1886_v55, %v1588_v60  ;;  %v1589_v0 = vmul.f32 %v2075_v19, %v1885_v29  ;;  %v2018_v20 = vpop.f32.mrb[4].mxu1 }
 0x138   : > { %v1613_v30 = vmax.f32 %v1605_v8, 0.0  ;;  %v1606_v10 = vadd.f32 %v1886_v55, %v1591_v12  ;;  %v925_v32 = vpop.f32.mrb[5].mxu1 }
 0x139   : > { %v1611_v7 = vmax.f32 %v1603_v63, 0.0  ;;  %v1604_v25 = vadd.f32 %v1886_v55, %v1589_v0  ;;  %v2066_v13 = vpop.f32.mrb[4].mxu0  ;;  %v2019_v56 = vpop.f32.mrb[6].mxu1 }
 0x13a   : > { %v1900_v59 = vpack.c.bf16 %v1613_v30, %v1613_v30  ;;  %v1614_v57 = vmax.f32 %v1606_v10, 0.0  ;;  %v2076_v26 = vadd.f32 %v2066_v13, %v2018_v20  ;;  %v1558_v58 = vpop.f32.mrb[5].mxu0  ;;  %v928_v18 = vpop.f32.mrb[7].mxu1 }
 0x13b   : > { %v1898_v24 = vpack.c.bf16 %v1611_v7, %v1611_v7  ;;  %v1612_v28 = vmax.f32 %v1604_v25, 0.0  ;;  %v2077_v34 = vadd.f32 %v1558_v58, %v925_v32  ;;  %v2067_v33 = vpop.f32.mrb[6].mxu0 }
 0x13c   : > { %1654 = vst.msk [vmem:[%s2680_s14 + $0x8] sm:$0xf] %vm1651_vm3, %v1900_v59  ;;  %v1901_v37 = vpack.c.bf16 %v1614_v57, %v1614_v57  ;;  %v1594_v16 = vmul.f32 %v2076_v26, %v1885_v29  ;;  %v2078_v47 = vadd.f32 %v2067_v33, %v2019_v56  ;;  %v1561_v17 = vpop.f32.mrb[7].mxu0 }
 0x13d   : > { %1652 = vst.msk [vmem:[%s2680_s14] sm:$0xf] %vm1651_vm3, %v1898_v24  ;;  %v1899_v11 = vpack.c.bf16 %v1612_v28, %v1612_v28  ;;  %v1592_v38 = vmul.f32 %v2077_v34, %v1885_v29  ;;  %v2079_v39 = vadd.f32 %v1561_v17, %v928_v18 }
 0x13e   : > { %1655 = vst.msk [vmem:[%s2680_s14 + $0xc] sm:$0xf] %vm1651_vm3, %v1901_v37  ;;  %v1609_v40 = vadd.f32 %v1886_v55, %v1594_v16  ;;  %v1595_v1 = vmul.f32 %v2078_v47, %v1885_v29 }
 0x13f   : > { %1653 = vst.msk [vmem:[%s2680_s14 + $0x4] sm:$0xf] %vm1651_vm3, %v1899_v11  ;;  %v1607_v23 = vadd.f32 %v1886_v55, %v1592_v38  ;;  %v1593_v52 = vmul.f32 %v2079_v39, %v1885_v29 }
 0x140   : > { %v1617_v27 = vmax.f32 %v1609_v40, 0.0  ;;  %v1610_v36 = vadd.f32 %v1886_v55, %v1595_v1 }
 0x141   : > { %v1615_v15 = vmax.f32 %v1607_v23, 0.0  ;;  %v1608_v43 = vadd.f32 %v1886_v55, %v1593_v52 }
 0x142   : > { %v1904_v61 = vpack.c.bf16 %v1617_v27, %v1617_v27  ;;  %v1618_v48 = vmax.f32 %v1610_v36, 0.0 }
 0x143   : > { %v1902_v31 = vpack.c.bf16 %v1615_v15, %v1615_v15  ;;  %v1616_v44 = vmax.f32 %v1608_v43, 0.0 }
 0x144   : > { %1658 = vst.msk [vmem:[%s2680_s14 + $0x18] sm:$0xf] %vm1651_vm3, %v1904_v61  ;;  %v1905_v3 = vpack.c.bf16 %v1618_v48, %v1618_v48 }
 0x145   : > { %1656 = vst.msk [vmem:[%s2680_s14 + $0x10] sm:$0xf] %vm1651_vm3, %v1902_v31  ;;  %v1903_v9 = vpack.c.bf16 %v1616_v44, %v1616_v44 }
 0x146   : > { %1659 = vst.msk [vmem:[%s2680_s14 + $0x1c] sm:$0xf] %vm1651_vm3, %v1905_v3 }
 0x147   : > { %1657 = vst.msk [vmem:[%s2680_s14 + $0x14] sm:$0xf] %vm1651_vm3, %v1903_v9 }
 0x148 PF: > { %s14_s15 = sadd.s32 1, %s2181_s15  }
 0x149   : > { %p11_p4 = scmp.ge.s32.totalorder %s14_s15, 4  }
 0x14b   :  { %13 = sbr.rel (!%p11_p4) target bundleno = 1 (0x1), region = 76 }

// kernel: _lambda_.17
= control target key start
LH: loop header
LB: loop body
LE: loop exit
PB: predicated region body
PF: predicated region fallthrough
CT: control target
= control target key end

     0   :  { %s540_s15 = smov 0   ;;  %s583_s0 = inlined_call_operand.vmem [shape: bf16[128,64], index: 0, kind: input, shape index: {}]   ;;  %s584_s1 = inlined_call_operand.vmem [shape: bf16[64,128], index: 1, kind: input, shape index: {}]   ;;  %s585_s2 = inlined_call_operand.vmem [shape: f32[1,128], index: 2, kind: input, shape index: {}]   ;;  %s586_s3 = inlined_call_operand.vmem [shape: f32[1,128], index: 3, kind: input, shape index: {}]   ;;  %s587_s4 = inlined_call_operand.vmem [shape: f32[128,128], index: 4, kind: output, shape index: {}]  }
   0x1 LB: > { %s434_s16 = sadd.s32 4294967295, %s513_s15   ;;  %p438_p0 = scmp.ge.s32.totalorder %s513_s15, 1  ;;  %s513_s15 = sphi %s540_s15, %s14_s15  }
   0x2   : > { %p163_p1 = scmp.lt.s32.totalorder %s513_s15, 3 }
   0x4   : > { %p164_p2 = pnand %p438_p0, %p163_p1 }
   0x5   : > { %v499_v0 = vld [vmem:[%s584_s1] sm:$0xff] (!%p164_p2)   ;;  %s439_s19 = sshll.u32 (!%p164_p2), %s434_s16, 3  ;;  %v500_v1 = vld [vmem:[%s584_s1 + $0x8] sm:$0xff] (!%p164_p2)   ;;  %v501_v2 = vld [vmem:[%s584_s1 + $0x10] sm:$0xff] (!%p164_p2)   ;;  %vm262_vm0 = vcmask (!%p164_p2), 523264  }
   0x6   : > { %167 = sbr.rel (%p164_p2) target bundleno = 242 (0xf2), region = 36  ;;  %p190_p3 = scmp.lt.s32.totalorder (!%p164_p2), %s439_s19, 15  ;;  %467 = vmatprep.subr.bf16.mxu0 (!%p164_p2), %v499_v0  ;;  %483 = vmatprep.subr.bf16.mxu1 (!%p164_p2), %v499_v0  ;;  %v502_v3 = vld [vmem:[%s584_s1 + $0x18] sm:$0xff] (!%p164_p2)   ;;  %v455_v8 = vld [vmem:[%s585_s2] ss:$0 sm:$0xff] (!%p164_p2) }
   0x7   : > { %468 = vmatpush3.bf16.msra.mxu0 (!%p164_p2), %v499_v0  ;;  %487 = vmatpush3.bf16.msra.mxu1 (!%p164_p2), %v499_v0  ;;  %v456_v10 = vld [vmem:[%s586_s3] ss:$0 sm:$0xff] (!%p164_p2) }
   0x8   : > { %469 = vmatprep.subr.bf16.mxu0 (!%p164_p2), %v500_v1  ;;  %484 = vmatprep.subr.bf16.mxu1 (!%p164_p2), %v500_v1 }
   0xb   : > { %470 = vmatpush3.bf16.msra.mxu0 (!%p164_p2), %v500_v1  ;;  %488 = vmatpush3.bf16.msra.mxu1 (!%p164_p2), %v500_v1 }
   0xc   : > { %471 = vmatprep.subr.bf16.mxu0 (!%p164_p2), %v501_v2  ;;  %485 = vmatprep.subr.bf16.mxu1 (!%p164_p2), %v501_v2 }
   0xd   : > { %s589_s19 = smov (!%p190_p3, %s439_s19), 15 }
   0xe   : > { %s440_s24 = sshll.u32 %s589_s19, 2  ;;  %s442_s6 = sshll.u32 %s589_s19, 3 }
   0xf   : > { %s193_s29 = scalar_lea.vmem %s583_s0, %s440_s24  ;;  %472 = vmatpush3.bf16.msra.mxu0 %v501_v2  ;;  %489 = vmatpush3.bf16.msra.mxu1 %v501_v2  ;;  %s199_s11 = scalar_lea.vmem %s587_s4, %s442_s6 }
  0x10   : > { %v503_v4 = vld [vmem:[%s193_s29] sm:$0xff]   ;;  %v504_v5 = vld [vmem:[%s193_s29 + $0x10] sm:$0xff]   ;;  %473 = vmatprep.subr.bf16.mxu0 %v502_v3  ;;  %486 = vmatprep.subr.bf16.mxu1 %v502_v3  ;;  %v505_v6 = vld [vmem:[%s193_s29 + $0x8] sm:$0xff]  }
  0x11   : > { %475 = vmatprep.mubr.msk.bf16.mxu0 %vm262_vm0, %v503_v4  ;;  %479 = vmatprep.mubr.msk.bf16.mxu1 %vm262_vm0, %v504_v5  ;;  %v506_v7 = vld [vmem:[%s193_s29 + $0x18] sm:$0xff]  }
  0x13   : > { %474 = vmatpush3.bf16.msra.mxu0 %v502_v3  ;;  %490 = vmatpush3.bf16.msra.mxu1 %v502_v3 }
  0x16   : > { %476 = vmatmul.mubr.msk.bf16.vlgmr.msra.gmra.mrb[0].mxu0 %vm262_vm0, %v505_v6  ;;  %480 = vmatmul.mubr.msk.bf16.vlgmr.msra.gmra.mrb[0].mxu1 %vm262_vm0, %v506_v7 }
  0xe9   : > { %v477_v9 = vpop.f32.mrb[0].mxu0  ;;  %v481_v11 = vpop.f32.mrb[0].mxu1 }
  0xea   : > { %v349_v12 = vmul.f32 %v477_v9, %v455_v8  ;;  %v353_v13 = vmul.f32 %v481_v11, %v455_v8  ;;  %v309_v14 = vpop.f32.mrb[1].mxu0  ;;  %v325_v15 = vpop.f32.mrb[1].mxu1 }
  0xeb   : > { %v347_v16 = vmul.f32 %v455_v8, %v309_v14  ;;  %v351_v17 = vmul.f32 %v455_v8, %v325_v15  ;;  %v478_v18 = vpop.f32.mrb[2].mxu0  ;;  %v482_v19 = vpop.f32.mrb[2].mxu1 }
  0xec   : > { %v364_v20 = vadd.f32 %v456_v10, %v349_v12  ;;  %v368_v21 = vadd.f32 %v456_v10, %v353_v13  ;;  %v350_v22 = vmul.f32 %v478_v18, %v455_v8  ;;  %v354_v23 = vmul.f32 %v482_v19, %v455_v8  ;;  %v312_v24 = vpop.f32.mrb[3].mxu0  ;;  %v328_v25 = vpop.f32.mrb[3].mxu1 }
  0xed   : > { %v362_v26 = vadd.f32 %v456_v10, %v347_v16  ;;  %v366_v27 = vadd.f32 %v456_v10, %v351_v17  ;;  %v348_v28 = vmul.f32 %v455_v8, %v312_v24  ;;  %v352_v29 = vmul.f32 %v455_v8, %v328_v25 }
  0xee   : > { %372 = vst [vmem:[%s199_s11 + $0x10] sm:$0xff] %v364_v20  ;;  %376 = vst [vmem:[%s199_s11 + $0x30] sm:$0xff] %v368_v21  ;;  %v365_v30 = vadd.f32 %v456_v10, %v350_v22  ;;  %v369_v31 = vadd.f32 %v456_v10, %v354_v23 }
  0xef   : > { %370 = vst [vmem:[%s199_s11] sm:$0xff] %v362_v26  ;;  %374 = vst [vmem:[%s199_s11 + $0x20] sm:$0xff] %v366_v27  ;;  %v363_v32 = vadd.f32 %v456_v10, %v348_v28  ;;  %v367_v33 = vadd.f32 %v456_v10, %v352_v29 }
  0xf0   : > { %373 = vst [vmem:[%s199_s11 + $0x18] sm:$0xff] %v365_v30  ;;  %377 = vst [vmem:[%s199_s11 + $0x38] sm:$0xff] %v369_v31 }
  0xf1   : > { %371 = vst [vmem:[%s199_s11 + $0x8] sm:$0xff] %v363_v32  ;;  %375 = vst [vmem:[%s199_s11 + $0x28] sm:$0xff] %v367_v33 }
  0xf2 PF: > { %s14_s15 = sadd.s32 1, %s513_s15  }
  0xf3   : > { %p11_p4 = scmp.ge.s32.totalorder %s14_s15, 4  }
  0xf5   :  { %13 = sbr.rel (!%p11_p4) target bundleno = 1 (0x1), region = 66 }

// kernel: _lambda_.16
= control target key start
LH: loop header
LB: loop body
LE: loop exit
PB: predicated region body
PF: predicated region fallthrough
CT: control target
= control target key end

     0   :  { %s524_s12 = smov 0   ;;  %s560_s0 = inlined_call_operand.vmem [shape: bf16[2,64,64], index: 0, kind: input, shape index: {}]   ;;  %s561_s1 = inlined_call_operand.vmem [shape: f32[2,1,64], index: 1, kind: input, shape index: {}]   ;;  %s562_s2 = inlined_call_operand.vmem [shape: bf16[2,64,64], index: 2, kind: input, shape index: {}]   ;;  %s563_s3 = inlined_call_operand.vmem [shape: bf16[2,64,64], index: 3, kind: output, shape index: {}]  }
   0x1 LB: > { %s417_s13 = sadd.s32 4294967295, %s502_s12   ;;  %p421_p0 = scmp.ge.s32.totalorder %s502_s12, 1  ;;  %s502_s12 = sphi %s524_s12, %s13_s12  }
   0x2   : > { %p155_p1 = scmp.lt.s32.totalorder %s502_s12, 3 }
   0x4   : > { %p156_p2 = pnand %p421_p0, %p155_p1 }
   0x5   : > { %p187_p3 = scmp.lt.s32.totalorder (!%p156_p2), %s417_s13, 1  ;;  %vm332_vm0 = vcmask (!%p156_p2), 519168  }
   0x6   : > { %159 = sbr.rel (%p156_p2) target bundleno = 44 (0x2c), region = 32 }
   0xd   : > { %s565_s13 = smov (!%p187_p3, %s417_s13), 1 }
   0xe   : > { %s532_s14 = sshll.u32 %s565_s13, 5  ;;  %s194_s17 = scalar_lea.vmem %s561_s1, %s565_s13 }
   0xf   : > { %s191_s20 = scalar_lea.vmem %s560_s0, %s532_s14  ;;  %s199_s23 = scalar_lea.vmem %s562_s2, %s532_s14  ;;  %v428_v0 = vld [vmem:[%s194_s17] ss:$0 sm:$0xff] }
  0x10   : > { %v451_v1 = vld [vmem:[%s199_s23] sm:$0xff]   ;;  %v482_v3 = vld [vmem:[%s199_s23 + $0x8] sm:$0xff]   ;;  %v483_v9 = vld [vmem:[%s199_s23 + $0x10] sm:$0xff]   ;;  %s204_s26 = scalar_lea.vmem %s563_s3, %s532_s14 }
  0x11   : > { %v467_v2 = vld [vmem:[%s191_s20] sm:$0xff]   ;;  %v452_v4 = vunpack.c.l.bf16 %v451_v1  ;;  %v453_v6 = vunpack.c.h.bf16 %v451_v1  ;;  %v485_v8 = vld [vmem:[%s191_s20 + $0x8] sm:$0xff]   ;;  %v486_v10 = vld [vmem:[%s191_s20 + $0x10] sm:$0xff]   ;;  %v456_v11 = vunpack.c.l.bf16 %v482_v3  ;;  %v457_v13 = vunpack.c.h.bf16 %v482_v3 }
  0x12   : > { %v468_v5 = vunpack.c.l.bf16 %v467_v2  ;;  %v469_v7 = vunpack.c.h.bf16 %v467_v2  ;;  %v472_v12 = vunpack.c.l.bf16 %v485_v8  ;;  %v473_v14 = vunpack.c.h.bf16 %v485_v8  ;;  %v484_v15 = vld [vmem:[%s199_s23 + $0x18] sm:$0xff]  }
  0x13   : > { %v460_v18 = vunpack.c.l.bf16 %v483_v9  ;;  %v476_v19 = vunpack.c.l.bf16 %v486_v10  ;;  %v487_v20 = vld [vmem:[%s191_s20 + $0x18] sm:$0xff]   ;;  %v461_v23 = vunpack.c.h.bf16 %v483_v9  ;;  %v477_v24 = vunpack.c.h.bf16 %v486_v10 }
  0x14   : > { %v244_v16 = vmul.f32 %v468_v5, %v428_v0  ;;  %v245_v17 = vmul.f32 %v469_v7, %v428_v0  ;;  %v246_v21 = vmul.f32 %v472_v12, %v428_v0  ;;  %v247_v22 = vmul.f32 %v473_v14, %v428_v0 }
  0x15   : > { %v248_v27 = vmul.f32 %v476_v19, %v428_v0  ;;  %v464_v28 = vunpack.c.l.bf16 %v484_v15  ;;  %v249_v31 = vmul.f32 %v477_v24, %v428_v0  ;;  %v480_v32 = vunpack.c.l.bf16 %v487_v20 }
  0x16   : > { %v252_v25 = vadd.f32 %v452_v4, %v244_v16  ;;  %v253_v26 = vadd.f32 %v453_v6, %v245_v17  ;;  %v254_v29 = vadd.f32 %v456_v11, %v246_v21  ;;  %v255_v30 = vadd.f32 %v457_v13, %v247_v22 }
  0x17   : > { %v256_v35 = vadd.f32 %v460_v18, %v248_v27  ;;  %v465_v36 = vunpack.c.h.bf16 %v484_v15  ;;  %v257_v39 = vadd.f32 %v461_v23, %v249_v31  ;;  %v250_v40 = vmul.f32 %v480_v32, %v428_v0 }
  0x18   : > { %v260_v33 = vadd.f32 3.0, %v252_v25  ;;  %v261_v34 = vadd.f32 3.0, %v253_v26  ;;  %v262_v37 = vadd.f32 3.0, %v254_v29  ;;  %v263_v38 = vadd.f32 3.0, %v255_v30 }
  0x19   : > { %v264_v43 = vadd.f32 3.0, %v256_v35  ;;  %v481_v44 = vunpack.c.h.bf16 %v487_v20  ;;  %v265_v47 = vadd.f32 3.0, %v257_v39  ;;  %v258_v48 = vadd.f32 %v464_v28, %v250_v40 }
  0x1a   : > { %v268_v41 = vmax.f32 %v260_v33, 0.0  ;;  %v269_v42 = vmax.f32 %v261_v34, 0.0  ;;  %v270_v45 = vmax.f32 %v262_v37, 0.0  ;;  %v271_v46 = vmax.f32 %v263_v38, 0.0 }
  0x1b   : > { %v272_v51 = vmax.f32 %v264_v43, 0.0  ;;  %v251_v52 = vmul.f32 %v481_v44, %v428_v0  ;;  %v273_v55 = vmax.f32 %v265_v47, 0.0  ;;  %v266_v56 = vadd.f32 3.0, %v258_v48 }
  0x1c   : > { %v276_v49 = vmin.f32 %v268_v41, 6.0  ;;  %v277_v50 = vmin.f32 %v269_v42, 6.0  ;;  %v278_v53 = vmin.f32 %v270_v45, 6.0  ;;  %v279_v54 = vmin.f32 %v271_v46, 6.0 }
  0x1d   : > { %v280_v59 = vmin.f32 %v272_v51, 6.0  ;;  %v259_v60 = vadd.f32 %v465_v36, %v251_v52  ;;  %v281_v63 = vmin.f32 %v273_v55, 6.0  ;;  %v274_v1 = vmax.f32 %v266_v56, 0.0 }
  0x1e   : > { %v284_v57 = vmul.f32 %v276_v49, %v252_v25  ;;  %v285_v58 = vmul.f32 %v277_v50, %v253_v26  ;;  %v286_v61 = vmul.f32 %v278_v53, %v254_v29  ;;  %v287_v62 = vmul.f32 %v279_v54, %v255_v30 }
  0x1f   : > { %v288_v4 = vmul.f32 %v280_v59, %v256_v35  ;;  %v267_v5 = vadd.f32 3.0, %v259_v60  ;;  %v289_v7 = vmul.f32 %v281_v63, %v257_v39  ;;  %v282_v8 = vmin.f32 %v274_v1, 6.0 }
  0x20   : > { %v292_v2 = vmul.f32 0.16666667, %v284_v57  ;;  %v293_v3 = vmul.f32 0.16666667, %v285_v58  ;;  %v294_v0 = vmul.f32 0.16666667, %v286_v61 }
  0x21   : > { %v295_v6 = vmul.f32 0.16666667, %v287_v62  ;;  %v296_v11 = vmul.f32 0.16666667, %v288_v4  ;;  %v275_v12 = vmax.f32 %v267_v5, 0.0  ;;  %v290_v16 = vmul.f32 %v282_v8, %v258_v48 }
  0x22   : > { %v442_v9 = vpack.c.bf16 %v292_v2, %v292_v2  ;;  %v443_v10 = vpack.c.bf16 %v293_v3, %v293_v3  ;;  %v444_v13 = vpack.c.bf16 %v294_v0, %v294_v0  ;;  %v297_v15 = vmul.f32 0.16666667, %v289_v7 }
  0x23   : > { %v445_v14 = vpack.c.bf16 %v295_v6, %v295_v6  ;;  %v446_v17 = vpack.c.bf16 %v296_v11, %v296_v11  ;;  %v283_v18 = vmin.f32 %v275_v12, 6.0  ;;  %v298_v20 = vmul.f32 0.16666667, %v290_v16 }
  0x24   : > { %333 = vst.msk [vmem:[%s204_s26] sm:$0xf] %vm332_vm0, %v442_v9  ;;  %334 = vst.msk [vmem:[%s204_s26 + $0x4] sm:$0xf] %vm332_vm0, %v443_v10  ;;  %v447_v19 = vpack.c.bf16 %v297_v15, %v297_v15 }
  0x25   : > { %335 = vst.msk [vmem:[%s204_s26 + $0x8] sm:$0xf] %vm332_vm0, %v444_v13  ;;  %336 = vst.msk [vmem:[%s204_s26 + $0xc] sm:$0xf] %vm332_vm0, %v445_v14  ;;  %v291_v21 = vmul.f32 %v283_v18, %v259_v60  ;;  %v448_v22 = vpack.c.bf16 %v298_v20, %v298_v20 }
  0x26   : > { %337 = vst.msk [vmem:[%s204_s26 + $0x10] sm:$0xf] %vm332_vm0, %v446_v17  ;;  %338 = vst.msk [vmem:[%s204_s26 + $0x14] sm:$0xf] %vm332_vm0, %v447_v19 }
  0x27   : > { %v299_v23 = vmul.f32 0.16666667, %v291_v21  ;;  %339 = vst.msk [vmem:[%s204_s26 + $0x18] sm:$0xf] %vm332_vm0, %v448_v22 }
  0x29   : > { %v449_v24 = vpack.c.bf16 %v299_v23, %v299_v23 }
  0x2b   : > { %340 = vst.msk [vmem:[%s204_s26 + $0x1c] sm:$0xf] %vm332_vm0, %v449_v24 }
  0x2c PF: > { %s13_s12 = sadd.s32 1, %s502_s12  }
  0x2d   : > { %p10_p4 = scmp.ge.s32.totalorder %s13_s12, 4  }
  0x2f   :  { %12 = sbr.rel (!%p10_p4) target bundleno = 1 (0x1), region = 68 }

</bundles_post_ra>
